<compile_context>
chip_gen: v6e
topology: v6e:2x2x1
jax: 0.10.0
libtpu: 0.0.40
codegen_flags: <defaults>
</compile_context>

<pallas_src>
import math

import jax
import jax.numpy as jnp
from jax.experimental import pallas as pl
from jax.experimental.pallas import tpu as pltpu

EMB = 128                     # embedding_dim (divisible by HEADS; = lane width)
HEADS = 4
DH = EMB // HEADS             # 32
MLP = 256                     # mlp_hidden_dim
LN_EPS = 1e-5                 # torch.nn.LayerNorm default
SCALE = 1.0 / math.sqrt(DH)   # torch: Q@K^T / sqrt(E // H)

MM_DTYPE = jnp.bfloat16       # matmul-operand dtype (f32 accumulation kept)

PARAM_KEYS = ["g1", "b1", "wqkv", "bqkv", "wo", "bo",
              "g2", "b2", "wm1", "bm1", "wm2", "bm2"]


# ----------------------------- in-kernel math helpers -----------------------------
def _erf(x):
    # Abramowitz & Stegun 7.1.26 — f32-accurate erf; exp runs on the EUP.
    # TODO(synk): tanh-form GELU would offload more onto the EUP slot but
    # deviates ~1e-3 from torch's exact GELU; keeping exact parity here.
    p = 0.3275911
    a1, a2, a3, a4, a5 = 0.254829592, -0.284496736, 1.421413741, -1.453152027, 1.061405429
    sgn = jnp.where(x >= 0.0, 1.0, -1.0)
    ax = jnp.abs(x)
    t = 1.0 / (1.0 + p * ax)
    poly = ((((a5 * t + a4) * t + a3) * t + a2) * t + a1) * t
    return sgn * (1.0 - poly * jnp.exp(-ax * ax))


def _gelu(x):
    # exact (erf-based) GELU, matching torch.nn.GELU() default
    return 0.5 * x * (1.0 + _erf(x * (1.0 / math.sqrt(2.0))))


def _layernorm(x, gamma, beta):
    mu = jnp.mean(x, axis=-1, keepdims=True)
    xc = x - mu
    var = jnp.mean(xc * xc, axis=-1, keepdims=True)
    return xc * jax.lax.rsqrt(var + LN_EPS) * gamma + beta


# ----------------------------------- kernel ---------------------------------------
def block_kernel(x_ref, g1_ref, b1_ref, wqkv_ref, bqkv_ref, wo_ref, bo_ref,
                 g2_ref, b2_ref, wm1_ref, bm1_ref, wm2_ref, bm2_ref, o_ref):
    TB, S, E = x_ref.shape
    R = TB * S
    x = x_ref[...].reshape(R, E)                                    # (R, E) f32

    # ---------------- multi-head self-attention branch ----------------
    xn = _layernorm(x, g1_ref[...], b1_ref[...])
    # fused Q/K/V projection: ONE lane-dense (R,128) @ (128,384) matmul
    qkv = jnp.dot(xn.astype(MM_DTYPE), wqkv_ref[...],
                  preferred_element_type=jnp.float32) + bqkv_ref[...]
    qkv = qkv.astype(MM_DTYPE).reshape(TB, S, 3 * E)                # cast once, reuse

    # per-head attention (tiny FLOPs vs projections); batch-leading einsums
    ctx_heads = []
    for h in range(HEADS):
        q_h = qkv[:, :, h * DH:(h + 1) * DH]                        # (TB, S, dh)
        k_h = qkv[:, :, E + h * DH:E + (h + 1) * DH]
        v_h = qkv[:, :, 2 * E + h * DH:2 * E + (h + 1) * DH]
        s_h = jnp.einsum("bqd,bkd->bqk", q_h, k_h,
                         preferred_element_type=jnp.float32) * SCALE
        m = jnp.max(s_h, axis=-1, keepdims=True)
        e = jnp.exp(s_h - m)
        p = e * pl.reciprocal(jnp.sum(e, axis=-1, keepdims=True), approx=True)
        # attn dropout: eval mode -> identity
        ctx_heads.append(jnp.einsum("bqk,bkd->bqd", p.astype(MM_DTYPE), v_h,
                                    preferred_element_type=jnp.float32))
    # merge heads -> single lane-dense K=128 output projection
    ctx = jnp.concatenate(ctx_heads, axis=-1).reshape(R, E)         # (R, E) f32
    attn = jnp.dot(ctx.astype(MM_DTYPE), wo_ref[...],
                   preferred_element_type=jnp.float32) + bo_ref[...]
    x = x + attn                                                    # residual

    # ---------------------------- MLP branch ---------------------------
    xn2 = _layernorm(x, g2_ref[...], b2_ref[...])
    h1 = jnp.dot(xn2.astype(MM_DTYPE), wm1_ref[...],
                 preferred_element_type=jnp.float32) + bm1_ref[...]
    h1 = _gelu(h1)
    m2 = jnp.dot(h1.astype(MM_DTYPE), wm2_ref[...],
                 preferred_element_type=jnp.float32) + bm2_ref[...]
    o_ref[...] = (x + m2).reshape(TB, S, E)


# ---------------------------------- wrapper ----------------------------------------
def _full_spec(a):
    zeros = (0,) * a.ndim
    return pl.BlockSpec(a.shape, lambda n, _z=zeros: _z)   # constant index -> resident


def self_attention_block(x, params, rows_per_step=512):
    """rows_per_step ~512 keeps the working set well under v5e's 16 MiB scoped
    VMEM while amortizing per-step overhead; grid extent stays >= 2 (v7x TCs)."""
    N, S, E = x.shape
    assert E == EMB
    tb = max(1, min(rows_per_step // S, N // 2 if N >= 2 else 1))
    while N % tb:                      # keep TB a divisor of N (static grid)
        tb -= 1
    grid = N // tb

    plist = [params[k] for k in PARAM_KEYS]

    # advisory cost estimate: projections + MLP dominate, attention is small
    flops_per_tok = 2 * E * (3 * E) + 2 * E * E + 2 * (2 * E * MLP) + 4 * S * E
    weight_bytes = 2 * (E * 3 * E + E * E + 2 * E * MLP)
    cost = pl.CostEstimate(
        flops=int(N * S * flops_per_tok),
        transcendentals=int(N * S * (MLP + HEADS * S)),
        bytes_accessed=int(N * S * E * 8 + weight_bytes),
    )

    return pl.pallas_call(
        block_kernel,
        out_shape=jax.ShapeDtypeStruct((N, S, E), jnp.float32),
        grid=(grid,),
        in_specs=[pl.BlockSpec((tb, S, E), lambda n: (n, 0, 0))]
                 + [_full_spec(a) for a in plist],
        out_specs=pl.BlockSpec((tb, S, E), lambda n: (n, 0, 0)),
        compiler_params=pltpu.CompilerParams(
            dimension_semantics=("parallel",),   # batch shards across v7x's 2 TCs
        ),
        cost_estimate=cost,
    )(x, *plist)


# ------------------------------ deterministic params -------------------------------
def prepare_params(p):
    """PyTorch layout (Linear weight = (out, in)) -> fused kernel layout."""
    E = EMB
    # torch's .view(N,S,H,dh) splits the output dim head-major, so plain
    # column-concatenation [Wq^T | Wk^T | Wv^T] keeps head ordering consistent.
    wqkv = jnp.concatenate([p["wq"].T, p["wk"].T, p["wv"].T], axis=1)   # (E, 3E)
    bqkv = jnp.concatenate([p["bq"], p["bk"], p["bv"]]).reshape(1, 3 * E)
    return {
        "g1": p["g1"].reshape(1, E).astype(jnp.float32),
        "b1": p["b1"].reshape(1, E).astype(jnp.float32),
        "wqkv": wqkv.astype(MM_DTYPE),                       # (E, 3E)
        "bqkv": bqkv.astype(jnp.float32),                    # (1, 3E)
        "wo": p["wo"].T.astype(MM_DTYPE),                    # (E, E)
        "bo": p["bo"].reshape(1, E).astype(jnp.float32),
        "g2": p["g2"].reshape(1, E).astype(jnp.float32),
        "b2": p["b2"].reshape(1, E).astype(jnp.float32),
        "wm1": p["wm1"].T.astype(MM_DTYPE),                  # (E, MLP)
        "bm1": p["bm1"].reshape(1, -1).astype(jnp.float32),
        "wm2": p["wm2"].T.astype(MM_DTYPE),                  # (MLP, E)
        "bm2": p["bm2"].reshape(1, E).astype(jnp.float32),
    }


def init_params(key, mlp_hidden_dim=MLP, embedding_dim=EMB):
    keys = iter(jax.random.split(key, 16))

    def nrm(shape, scale=0.02):
        return (scale * jax.random.normal(next(keys), shape)).astype(jnp.float32)

    E, Hd = embedding_dim, mlp_hidden_dim
    raw = {
        "g1": 1.0 + nrm((E,)), "b1": nrm((E,)),
        "wq": nrm((E, E)), "bq": nrm((E,)),
        "wk": nrm((E, E)), "bk": nrm((E,)),
        "wv": nrm((E, E)), "bv": nrm((E,)),
        "wo": nrm((E, E)), "bo": nrm((E,)),
        "g2": 1.0 + nrm((E,)), "b2": nrm((E,)),
        "wm1": nrm((Hd, E)), "bm1": nrm((Hd,)),
        "wm2": nrm((E, Hd)), "bm2": nrm((E,)),
    }
    return prepare_params(raw)


if __name__ == "__main__":
    key = jax.random.PRNGKey(0)
    kp, kx = jax.random.split(key)
    params = init_params(kp)

    N, S = 8, 8
    x = jax.random.normal(kx, (N, S, EMB), dtype=jnp.float32)

    out = jax.block_until_ready(self_attention_block(x, params))
    assert out.shape == (N, S, EMB) and out.dtype == jnp.float32
    assert bool(jnp.all(jnp.isfinite(out)))
    print("KERNEL_OK")
</pallas_src>

<mosaic_0001>
module attributes {stable_mosaic.version = 11 : i64} {
  func.func @block_kernel(%arg0: i32, %arg1: memref<4x8x128xf32, #tpu.memory_space<vmem>>, %arg2: memref<1x128xf32, #tpu.memory_space<vmem>>, %arg3: memref<1x128xf32, #tpu.memory_space<vmem>>, %arg4: memref<128x384xbf16, #tpu.memory_space<vmem>>, %arg5: memref<1x384xf32, #tpu.memory_space<vmem>>, %arg6: memref<128x128xbf16, #tpu.memory_space<vmem>>, %arg7: memref<1x128xf32, #tpu.memory_space<vmem>>, %arg8: memref<1x128xf32, #tpu.memory_space<vmem>>, %arg9: memref<1x128xf32, #tpu.memory_space<vmem>>, %arg10: memref<128x256xbf16, #tpu.memory_space<vmem>>, %arg11: memref<1x256xf32, #tpu.memory_space<vmem>>, %arg12: memref<256x128xbf16, #tpu.memory_space<vmem>>, %arg13: memref<1x128xf32, #tpu.memory_space<vmem>>, %arg14: memref<4x8x128xf32, #tpu.memory_space<vmem>>) attributes {dimension_semantics = [#tpu.dimension_semantics<parallel>], iteration_bounds = array<i64: 2>, scalar_prefetch = 0 : i64, scratch_operands = 0 : i64, tpu.core_type = #tpu.core_type<tc>, window_params = [{transform_indices = @transform_0, window_bounds = array<i64: 4, 8, 128>}, {pipeline_mode = #tpu.pipeline_mode<synchronous>, transform_indices = @transform_1, window_bounds = array<i64: 1, 128>}, {pipeline_mode = #tpu.pipeline_mode<synchronous>, transform_indices = @transform_2, window_bounds = array<i64: 1, 128>}, {pipeline_mode = #tpu.pipeline_mode<synchronous>, transform_indices = @transform_3, window_bounds = array<i64: 128, 384>}, {pipeline_mode = #tpu.pipeline_mode<synchronous>, transform_indices = @transform_4, window_bounds = array<i64: 1, 384>}, {pipeline_mode = #tpu.pipeline_mode<synchronous>, transform_indices = @transform_5, window_bounds = array<i64: 128, 128>}, {pipeline_mode = #tpu.pipeline_mode<synchronous>, transform_indices = @transform_6, window_bounds = array<i64: 1, 128>}, {pipeline_mode = #tpu.pipeline_mode<synchronous>, transform_indices = @transform_7, window_bounds = array<i64: 1, 128>}, {pipeline_mode = #tpu.pipeline_mode<synchronous>, transform_indices = @transform_8, window_bounds = array<i64: 1, 128>}, {pipeline_mode = #tpu.pipeline_mode<synchronous>, transform_indices = @transform_9, window_bounds = array<i64: 128, 256>}, {pipeline_mode = #tpu.pipeline_mode<synchronous>, transform_indices = @transform_10, window_bounds = array<i64: 1, 256>}, {pipeline_mode = #tpu.pipeline_mode<synchronous>, transform_indices = @transform_11, window_bounds = array<i64: 256, 128>}, {pipeline_mode = #tpu.pipeline_mode<synchronous>, transform_indices = @transform_12, window_bounds = array<i64: 1, 128>}, {transform_indices = @transform_13, window_bounds = array<i64: 4, 8, 128>}]} {
    %c0 = arith.constant 0 : index
    %c0_0 = arith.constant 0 : index
    %c0_1 = arith.constant 0 : index
    %0 = vector.load %arg1[%c0, %c0_0, %c0_1] : memref<4x8x128xf32, #tpu.memory_space<vmem>>, vector<4x8x128xf32>
    %1 = vector.shape_cast %0 : vector<4x8x128xf32> to vector<32x128xf32>
    %c0_2 = arith.constant 0 : index
    %c0_3 = arith.constant 0 : index
    %2 = vector.load %arg2[%c0_2, %c0_3] : memref<1x128xf32, #tpu.memory_space<vmem>>, vector<1x128xf32>
    %c0_4 = arith.constant 0 : index
    %c0_5 = arith.constant 0 : index
    %3 = vector.load %arg3[%c0_4, %c0_5] : memref<1x128xf32, #tpu.memory_space<vmem>>, vector<1x128xf32>
    %cst = arith.constant dense<0.000000e+00> : vector<32xf32>
    %4 = vector.multi_reduction <add>, %1, %cst [1] : vector<32x128xf32> to vector<32xf32>
    %5 = vector.shape_cast %4 : vector<32xf32> to vector<32x1xf32>
    %cst_6 = arith.constant 1.280000e+02 : f32
    %6 = vector.broadcast %cst_6 : f32 to vector<32x1xf32>
    %7 = arith.divf %5, %6 : vector<32x1xf32>
    %8 = vector.broadcast %7 : vector<32x1xf32> to vector<32x128xf32>
    %9 = arith.subf %1, %8 : vector<32x128xf32>
    %10 = arith.mulf %9, %9 : vector<32x128xf32>
    %cst_7 = arith.constant dense<0.000000e+00> : vector<32xf32>
    %11 = vector.multi_reduction <add>, %10, %cst_7 [1] : vector<32x128xf32> to vector<32xf32>
    %12 = vector.shape_cast %11 : vector<32xf32> to vector<32x1xf32>
    %cst_8 = arith.constant 1.280000e+02 : f32
    %13 = vector.broadcast %cst_8 : f32 to vector<32x1xf32>
    %14 = arith.divf %12, %13 : vector<32x1xf32>
    %cst_9 = arith.constant 9.99999974E-6 : f32
    %15 = vector.broadcast %cst_9 : f32 to vector<32x1xf32>
    %16 = arith.addf %14, %15 : vector<32x1xf32>
    %17 = math.rsqrt %16 : vector<32x1xf32>
    %18 = vector.broadcast %17 : vector<32x1xf32> to vector<32x128xf32>
    %19 = arith.mulf %9, %18 : vector<32x128xf32>
    %20 = vector.broadcast %2 : vector<1x128xf32> to vector<32x128xf32>
    %21 = arith.mulf %19, %20 : vector<32x128xf32>
    %22 = vector.broadcast %3 : vector<1x128xf32> to vector<32x128xf32>
    %23 = arith.addf %21, %22 : vector<32x128xf32>
    %24 = arith.truncf %23 : vector<32x128xf32> to vector<32x128xbf16>
    %c0_10 = arith.constant 0 : index
    %c0_11 = arith.constant 0 : index
    %25 = vector.load %arg4[%c0_10, %c0_11] : memref<128x384xbf16, #tpu.memory_space<vmem>>, vector<128x384xbf16>
    %cst_12 = arith.constant dense<0.000000e+00> : vector<32x384xf32>
    %26 = tpu.matmul %24, %25, %cst_12 {dimension_numbers = #tpu.dot_dimension_numbers<[1], [0], [0], [1], [0, 0, 1, 1], [], []>} : vector<32x128xbf16>, vector<128x384xbf16>, vector<32x384xf32> -> vector<32x384xf32>
    %c0_13 = arith.constant 0 : index
    %c0_14 = arith.constant 0 : index
    %27 = vector.load %arg5[%c0_13, %c0_14] : memref<1x384xf32, #tpu.memory_space<vmem>>, vector<1x384xf32>
    %28 = vector.broadcast %27 : vector<1x384xf32> to vector<32x384xf32>
    %29 = arith.addf %26, %28 : vector<32x384xf32>
    %30 = arith.truncf %29 : vector<32x384xf32> to vector<32x384xbf16>
    %31 = vector.shape_cast %30 : vector<32x384xbf16> to vector<4x8x384xbf16>
    %32 = vector.extract_strided_slice %31 {offsets = [0, 0, 0], sizes = [4, 8, 32], strides = [1, 1, 1]} : vector<4x8x384xbf16> to vector<4x8x32xbf16>
    %33 = vector.extract_strided_slice %31 {offsets = [0, 0, 128], sizes = [4, 8, 32], strides = [1, 1, 1]} : vector<4x8x384xbf16> to vector<4x8x32xbf16>
    %34 = vector.extract_strided_slice %31 {offsets = [0, 0, 256], sizes = [4, 8, 32], strides = [1, 1, 1]} : vector<4x8x384xbf16> to vector<4x8x32xbf16>
    "tpu.trace_start"() <{level = 10 : i32, message = "bqd,bkd->bqk"}> : () -> ()
    %cst_15 = arith.constant dense<0.000000e+00> : vector<4x8x8xf32>
    %35 = tpu.matmul %32, %33, %cst_15 {dimension_numbers = #tpu.dot_dimension_numbers<[2], [2], [1], [1], [0, 0, 0, 1, 1, 1], [0], [0]>} : vector<4x8x32xbf16>, vector<4x8x32xbf16>, vector<4x8x8xf32> -> vector<4x8x8xf32>
    "tpu.trace_stop"() : () -> ()
    %cst_16 = arith.constant 0.176776692 : f32
    %36 = vector.broadcast %cst_16 : f32 to vector<4x8x8xf32>
    %37 = arith.mulf %35, %36 : vector<4x8x8xf32>
    %cst_17 = arith.constant dense<0xFF800000> : vector<4x8xf32>
    %38 = vector.multi_reduction <maximumf>, %37, %cst_17 [2] : vector<4x8x8xf32> to vector<4x8xf32>
    %39 = vector.shape_cast %38 : vector<4x8xf32> to vector<4x8x1xf32>
    %40 = vector.broadcast %39 : vector<4x8x1xf32> to vector<4x8x8xf32>
    %41 = arith.subf %37, %40 : vector<4x8x8xf32>
    %42 = math.exp %41 : vector<4x8x8xf32>
    %cst_18 = arith.constant dense<0.000000e+00> : vector<4x8xf32>
    %43 = vector.multi_reduction <add>, %42, %cst_18 [2] : vector<4x8x8xf32> to vector<4x8xf32>
    %44 = vector.shape_cast %43 : vector<4x8xf32> to vector<4x8x1xf32>
    %45 = tpu.reciprocal %44 {approx = true} : vector<4x8x1xf32> -> vector<4x8x1xf32>
    %46 = vector.broadcast %45 : vector<4x8x1xf32> to vector<4x8x8xf32>
    %47 = arith.mulf %42, %46 : vector<4x8x8xf32>
    %48 = arith.truncf %47 : vector<4x8x8xf32> to vector<4x8x8xbf16>
    "tpu.trace_start"() <{level = 10 : i32, message = "bqk,bkd->bqd"}> : () -> ()
    %cst_19 = arith.constant dense<0.000000e+00> : vector<4x8x32xf32>
    %49 = tpu.matmul %48, %34, %cst_19 {dimension_numbers = #tpu.dot_dimension_numbers<[2], [1], [1], [2], [0, 0, 0, 1, 1, 2], [0], [0]>} : vector<4x8x8xbf16>, vector<4x8x32xbf16>, vector<4x8x32xf32> -> vector<4x8x32xf32>
    "tpu.trace_stop"() : () -> ()
    %50 = vector.extract_strided_slice %31 {offsets = [0, 0, 32], sizes = [4, 8, 32], strides = [1, 1, 1]} : vector<4x8x384xbf16> to vector<4x8x32xbf16>
    %51 = vector.extract_strided_slice %31 {offsets = [0, 0, 160], sizes = [4, 8, 32], strides = [1, 1, 1]} : vector<4x8x384xbf16> to vector<4x8x32xbf16>
    %52 = vector.extract_strided_slice %31 {offsets = [0, 0, 288], sizes = [4, 8, 32], strides = [1, 1, 1]} : vector<4x8x384xbf16> to vector<4x8x32xbf16>
    "tpu.trace_start"() <{level = 10 : i32, message = "bqd,bkd->bqk"}> : () -> ()
    %cst_20 = arith.constant dense<0.000000e+00> : vector<4x8x8xf32>
    %53 = tpu.matmul %50, %51, %cst_20 {dimension_numbers = #tpu.dot_dimension_numbers<[2], [2], [1], [1], [0, 0, 0, 1, 1, 1], [0], [0]>} : vector<4x8x32xbf16>, vector<4x8x32xbf16>, vector<4x8x8xf32> -> vector<4x8x8xf32>
    "tpu.trace_stop"() : () -> ()
    %cst_21 = arith.constant 0.176776692 : f32
    %54 = vector.broadcast %cst_21 : f32 to vector<4x8x8xf32>
    %55 = arith.mulf %53, %54 : vector<4x8x8xf32>
    %cst_22 = arith.constant dense<0xFF800000> : vector<4x8xf32>
    %56 = vector.multi_reduction <maximumf>, %55, %cst_22 [2] : vector<4x8x8xf32> to vector<4x8xf32>
    %57 = vector.shape_cast %56 : vector<4x8xf32> to vector<4x8x1xf32>
    %58 = vector.broadcast %57 : vector<4x8x1xf32> to vector<4x8x8xf32>
    %59 = arith.subf %55, %58 : vector<4x8x8xf32>
    %60 = math.exp %59 : vector<4x8x8xf32>
    %cst_23 = arith.constant dense<0.000000e+00> : vector<4x8xf32>
    %61 = vector.multi_reduction <add>, %60, %cst_23 [2] : vector<4x8x8xf32> to vector<4x8xf32>
    %62 = vector.shape_cast %61 : vector<4x8xf32> to vector<4x8x1xf32>
    %63 = tpu.reciprocal %62 {approx = true} : vector<4x8x1xf32> -> vector<4x8x1xf32>
    %64 = vector.broadcast %63 : vector<4x8x1xf32> to vector<4x8x8xf32>
    %65 = arith.mulf %60, %64 : vector<4x8x8xf32>
    %66 = arith.truncf %65 : vector<4x8x8xf32> to vector<4x8x8xbf16>
    "tpu.trace_start"() <{level = 10 : i32, message = "bqk,bkd->bqd"}> : () -> ()
    %cst_24 = arith.constant dense<0.000000e+00> : vector<4x8x32xf32>
    %67 = tpu.matmul %66, %52, %cst_24 {dimension_numbers = #tpu.dot_dimension_numbers<[2], [1], [1], [2], [0, 0, 0, 1, 1, 2], [0], [0]>} : vector<4x8x8xbf16>, vector<4x8x32xbf16>, vector<4x8x32xf32> -> vector<4x8x32xf32>
    "tpu.trace_stop"() : () -> ()
    %68 = vector.extract_strided_slice %31 {offsets = [0, 0, 64], sizes = [4, 8, 32], strides = [1, 1, 1]} : vector<4x8x384xbf16> to vector<4x8x32xbf16>
    %69 = vector.extract_strided_slice %31 {offsets = [0, 0, 192], sizes = [4, 8, 32], strides = [1, 1, 1]} : vector<4x8x384xbf16> to vector<4x8x32xbf16>
    %70 = vector.extract_strided_slice %31 {offsets = [0, 0, 320], sizes = [4, 8, 32], strides = [1, 1, 1]} : vector<4x8x384xbf16> to vector<4x8x32xbf16>
    "tpu.trace_start"() <{level = 10 : i32, message = "bqd,bkd->bqk"}> : () -> ()
    %cst_25 = arith.constant dense<0.000000e+00> : vector<4x8x8xf32>
    %71 = tpu.matmul %68, %69, %cst_25 {dimension_numbers = #tpu.dot_dimension_numbers<[2], [2], [1], [1], [0, 0, 0, 1, 1, 1], [0], [0]>} : vector<4x8x32xbf16>, vector<4x8x32xbf16>, vector<4x8x8xf32> -> vector<4x8x8xf32>
    "tpu.trace_stop"() : () -> ()
    %cst_26 = arith.constant 0.176776692 : f32
    %72 = vector.broadcast %cst_26 : f32 to vector<4x8x8xf32>
    %73 = arith.mulf %71, %72 : vector<4x8x8xf32>
    %cst_27 = arith.constant dense<0xFF800000> : vector<4x8xf32>
    %74 = vector.multi_reduction <maximumf>, %73, %cst_27 [2] : vector<4x8x8xf32> to vector<4x8xf32>
    %75 = vector.shape_cast %74 : vector<4x8xf32> to vector<4x8x1xf32>
    %76 = vector.broadcast %75 : vector<4x8x1xf32> to vector<4x8x8xf32>
    %77 = arith.subf %73, %76 : vector<4x8x8xf32>
    %78 = math.exp %77 : vector<4x8x8xf32>
    %cst_28 = arith.constant dense<0.000000e+00> : vector<4x8xf32>
    %79 = vector.multi_reduction <add>, %78, %cst_28 [2] : vector<4x8x8xf32> to vector<4x8xf32>
    %80 = vector.shape_cast %79 : vector<4x8xf32> to vector<4x8x1xf32>
    %81 = tpu.reciprocal %80 {approx = true} : vector<4x8x1xf32> -> vector<4x8x1xf32>
    %82 = vector.broadcast %81 : vector<4x8x1xf32> to vector<4x8x8xf32>
    %83 = arith.mulf %78, %82 : vector<4x8x8xf32>
    %84 = arith.truncf %83 : vector<4x8x8xf32> to vector<4x8x8xbf16>
    "tpu.trace_start"() <{level = 10 : i32, message = "bqk,bkd->bqd"}> : () -> ()
    %cst_29 = arith.constant dense<0.000000e+00> : vector<4x8x32xf32>
    %85 = tpu.matmul %84, %70, %cst_29 {dimension_numbers = #tpu.dot_dimension_numbers<[2], [1], [1], [2], [0, 0, 0, 1, 1, 2], [0], [0]>} : vector<4x8x8xbf16>, vector<4x8x32xbf16>, vector<4x8x32xf32> -> vector<4x8x32xf32>
    "tpu.trace_stop"() : () -> ()
    %86 = vector.extract_strided_slice %31 {offsets = [0, 0, 96], sizes = [4, 8, 32], strides = [1, 1, 1]} : vector<4x8x384xbf16> to vector<4x8x32xbf16>
    %87 = vector.extract_strided_slice %31 {offsets = [0, 0, 224], sizes = [4, 8, 32], strides = [1, 1, 1]} : vector<4x8x384xbf16> to vector<4x8x32xbf16>
    %88 = vector.extract_strided_slice %31 {offsets = [0, 0, 352], sizes = [4, 8, 32], strides = [1, 1, 1]} : vector<4x8x384xbf16> to vector<4x8x32xbf16>
    "tpu.trace_start"() <{level = 10 : i32, message = "bqd,bkd->bqk"}> : () -> ()
    %cst_30 = arith.constant dense<0.000000e+00> : vector<4x8x8xf32>
    %89 = tpu.matmul %86, %87, %cst_30 {dimension_numbers = #tpu.dot_dimension_numbers<[2], [2], [1], [1], [0, 0, 0, 1, 1, 1], [0], [0]>} : vector<4x8x32xbf16>, vector<4x8x32xbf16>, vector<4x8x8xf32> -> vector<4x8x8xf32>
    "tpu.trace_stop"() : () -> ()
    %cst_31 = arith.constant 0.176776692 : f32
    %90 = vector.broadcast %cst_31 : f32 to vector<4x8x8xf32>
    %91 = arith.mulf %89, %90 : vector<4x8x8xf32>
    %cst_32 = arith.constant dense<0xFF800000> : vector<4x8xf32>
    %92 = vector.multi_reduction <maximumf>, %91, %cst_32 [2] : vector<4x8x8xf32> to vector<4x8xf32>
    %93 = vector.shape_cast %92 : vector<4x8xf32> to vector<4x8x1xf32>
    %94 = vector.broadcast %93 : vector<4x8x1xf32> to vector<4x8x8xf32>
    %95 = arith.subf %91, %94 : vector<4x8x8xf32>
    %96 = math.exp %95 : vector<4x8x8xf32>
    %cst_33 = arith.constant dense<0.000000e+00> : vector<4x8xf32>
    %97 = vector.multi_reduction <add>, %96, %cst_33 [2] : vector<4x8x8xf32> to vector<4x8xf32>
    %98 = vector.shape_cast %97 : vector<4x8xf32> to vector<4x8x1xf32>
    %99 = tpu.reciprocal %98 {approx = true} : vector<4x8x1xf32> -> vector<4x8x1xf32>
    %100 = vector.broadcast %99 : vector<4x8x1xf32> to vector<4x8x8xf32>
    %101 = arith.mulf %96, %100 : vector<4x8x8xf32>
    %102 = arith.truncf %101 : vector<4x8x8xf32> to vector<4x8x8xbf16>
    "tpu.trace_start"() <{level = 10 : i32, message = "bqk,bkd->bqd"}> : () -> ()
    %cst_34 = arith.constant dense<0.000000e+00> : vector<4x8x32xf32>
    %103 = tpu.matmul %102, %88, %cst_34 {dimension_numbers = #tpu.dot_dimension_numbers<[2], [1], [1], [2], [0, 0, 0, 1, 1, 2], [0], [0]>} : vector<4x8x8xbf16>, vector<4x8x32xbf16>, vector<4x8x32xf32> -> vector<4x8x32xf32>
    "tpu.trace_stop"() : () -> ()
    %104 = tpu.concatenate %49, %67, %85, %103 in 2 : vector<4x8x32xf32>, vector<4x8x32xf32>, vector<4x8x32xf32>, vector<4x8x32xf32> -> vector<4x8x128xf32>
    %105 = vector.shape_cast %104 : vector<4x8x128xf32> to vector<32x128xf32>
    %106 = arith.truncf %105 : vector<32x128xf32> to vector<32x128xbf16>
    %c0_35 = arith.constant 0 : index
    %c0_36 = arith.constant 0 : index
    %107 = vector.load %arg6[%c0_35, %c0_36] : memref<128x128xbf16, #tpu.memory_space<vmem>>, vector<128x128xbf16>
    %cst_37 = arith.constant dense<0.000000e+00> : vector<32x128xf32>
    %108 = tpu.matmul %106, %107, %cst_37 {dimension_numbers = #tpu.dot_dimension_numbers<[1], [0], [0], [1], [0, 0, 1, 1], [], []>} : vector<32x128xbf16>, vector<128x128xbf16>, vector<32x128xf32> -> vector<32x128xf32>
    %c0_38 = arith.constant 0 : index
    %c0_39 = arith.constant 0 : index
    %109 = vector.load %arg7[%c0_38, %c0_39] : memref<1x128xf32, #tpu.memory_space<vmem>>, vector<1x128xf32>
    %110 = vector.broadcast %109 : vector<1x128xf32> to vector<32x128xf32>
    %111 = arith.addf %108, %110 : vector<32x128xf32>
    %112 = arith.addf %1, %111 : vector<32x128xf32>
    %c0_40 = arith.constant 0 : index
    %c0_41 = arith.constant 0 : index
    %113 = vector.load %arg8[%c0_40, %c0_41] : memref<1x128xf32, #tpu.memory_space<vmem>>, vector<1x128xf32>
    %c0_42 = arith.constant 0 : index
    %c0_43 = arith.constant 0 : index
    %114 = vector.load %arg9[%c0_42, %c0_43] : memref<1x128xf32, #tpu.memory_space<vmem>>, vector<1x128xf32>
    %cst_44 = arith.constant dense<0.000000e+00> : vector<32xf32>
    %115 = vector.multi_reduction <add>, %112, %cst_44 [1] : vector<32x128xf32> to vector<32xf32>
    %116 = vector.shape_cast %115 : vector<32xf32> to vector<32x1xf32>
    %cst_45 = arith.constant 1.280000e+02 : f32
    %117 = vector.broadcast %cst_45 : f32 to vector<32x1xf32>
    %118 = arith.divf %116, %117 : vector<32x1xf32>
    %119 = vector.broadcast %118 : vector<32x1xf32> to vector<32x128xf32>
    %120 = arith.subf %112, %119 : vector<32x128xf32>
    %121 = arith.mulf %120, %120 : vector<32x128xf32>
    %cst_46 = arith.constant dense<0.000000e+00> : vector<32xf32>
    %122 = vector.multi_reduction <add>, %121, %cst_46 [1] : vector<32x128xf32> to vector<32xf32>
    %123 = vector.shape_cast %122 : vector<32xf32> to vector<32x1xf32>
    %cst_47 = arith.constant 1.280000e+02 : f32
    %124 = vector.broadcast %cst_47 : f32 to vector<32x1xf32>
    %125 = arith.divf %123, %124 : vector<32x1xf32>
    %cst_48 = arith.constant 9.99999974E-6 : f32
    %126 = vector.broadcast %cst_48 : f32 to vector<32x1xf32>
    %127 = arith.addf %125, %126 : vector<32x1xf32>
    %128 = math.rsqrt %127 : vector<32x1xf32>
    %129 = vector.broadcast %128 : vector<32x1xf32> to vector<32x128xf32>
    %130 = arith.mulf %120, %129 : vector<32x128xf32>
    %131 = vector.broadcast %113 : vector<1x128xf32> to vector<32x128xf32>
    %132 = arith.mulf %130, %131 : vector<32x128xf32>
    %133 = vector.broadcast %114 : vector<1x128xf32> to vector<32x128xf32>
    %134 = arith.addf %132, %133 : vector<32x128xf32>
    %135 = arith.truncf %134 : vector<32x128xf32> to vector<32x128xbf16>
    %c0_49 = arith.constant 0 : index
    %c0_50 = arith.constant 0 : index
    %136 = vector.load %arg10[%c0_49, %c0_50] : memref<128x256xbf16, #tpu.memory_space<vmem>>, vector<128x256xbf16>
    %cst_51 = arith.constant dense<0.000000e+00> : vector<32x256xf32>
    %137 = tpu.matmul %135, %136, %cst_51 {dimension_numbers = #tpu.dot_dimension_numbers<[1], [0], [0], [1], [0, 0, 1, 1], [], []>} : vector<32x128xbf16>, vector<128x256xbf16>, vector<32x256xf32> -> vector<32x256xf32>
    %c0_52 = arith.constant 0 : index
    %c0_53 = arith.constant 0 : index
    %138 = vector.load %arg11[%c0_52, %c0_53] : memref<1x256xf32, #tpu.memory_space<vmem>>, vector<1x256xf32>
    %139 = vector.broadcast %138 : vector<1x256xf32> to vector<32x256xf32>
    %140 = arith.addf %137, %139 : vector<32x256xf32>
    %cst_54 = arith.constant 5.000000e-01 : f32
    %141 = vector.broadcast %cst_54 : f32 to vector<32x256xf32>
    %142 = arith.mulf %141, %140 : vector<32x256xf32>
    %cst_55 = arith.constant 0.707106769 : f32
    %143 = vector.broadcast %cst_55 : f32 to vector<32x256xf32>
    %144 = arith.mulf %140, %143 : vector<32x256xf32>
    %cst_56 = arith.constant 0.000000e+00 : f32
    %145 = vector.broadcast %cst_56 : f32 to vector<32x256xf32>
    %146 = arith.cmpf oge, %144, %145 : vector<32x256xf32>
    %cst_57 = arith.constant 1.000000e+00 : f32
    %cst_58 = arith.constant -1.000000e+00 : f32
    %147 = vector.broadcast %cst_57 : f32 to vector<32x256xf32>
    %148 = vector.broadcast %cst_58 : f32 to vector<32x256xf32>
    %149 = arith.select %146, %147, %148 : vector<32x256xi1>, vector<32x256xf32>
    %150 = math.absf %144 : vector<32x256xf32>
    %cst_59 = arith.constant 0.327591091 : f32
    %151 = vector.broadcast %cst_59 : f32 to vector<32x256xf32>
    %152 = arith.mulf %151, %150 : vector<32x256xf32>
    %cst_60 = arith.constant 1.000000e+00 : f32
    %153 = vector.broadcast %cst_60 : f32 to vector<32x256xf32>
    %154 = arith.addf %153, %152 : vector<32x256xf32>
    %cst_61 = arith.constant 1.000000e+00 : f32
    %155 = vector.broadcast %cst_61 : f32 to vector<32x256xf32>
    %156 = arith.divf %155, %154 : vector<32x256xf32>
    %cst_62 = arith.constant 1.06140542 : f32
    %157 = vector.broadcast %cst_62 : f32 to vector<32x256xf32>
    %158 = arith.mulf %157, %156 : vector<32x256xf32>
    %cst_63 = arith.constant -1.45315206 : f32
    %159 = vector.broadcast %cst_63 : f32 to vector<32x256xf32>
    %160 = arith.addf %158, %159 : vector<32x256xf32>
    %161 = arith.mulf %160, %156 : vector<32x256xf32>
    %cst_64 = arith.constant 1.42141378 : f32
    %162 = vector.broadcast %cst_64 : f32 to vector<32x256xf32>
    %163 = arith.addf %161, %162 : vector<32x256xf32>
    %164 = arith.mulf %163, %156 : vector<32x256xf32>
    %cst_65 = arith.constant -0.284496725 : f32
    %165 = vector.broadcast %cst_65 : f32 to vector<32x256xf32>
    %166 = arith.addf %164, %165 : vector<32x256xf32>
    %167 = arith.mulf %166, %156 : vector<32x256xf32>
    %cst_66 = arith.constant 0.254829586 : f32
    %168 = vector.broadcast %cst_66 : f32 to vector<32x256xf32>
    %169 = arith.addf %167, %168 : vector<32x256xf32>
    %170 = arith.mulf %169, %156 : vector<32x256xf32>
    %cst_67 = arith.constant 0.000000e+00 : f32
    %171 = vector.broadcast %cst_67 : f32 to vector<32x256xf32>
    %172 = arith.subf %171, %150 : vector<32x256xf32>
    %173 = arith.mulf %172, %150 : vector<32x256xf32>
    %174 = math.exp %173 : vector<32x256xf32>
    %175 = arith.mulf %170, %174 : vector<32x256xf32>
    %cst_68 = arith.constant 1.000000e+00 : f32
    %176 = vector.broadcast %cst_68 : f32 to vector<32x256xf32>
    %177 = arith.subf %176, %175 : vector<32x256xf32>
    %178 = arith.mulf %149, %177 : vector<32x256xf32>
    %cst_69 = arith.constant 1.000000e+00 : f32
    %179 = vector.broadcast %cst_69 : f32 to vector<32x256xf32>
    %180 = arith.addf %179, %178 : vector<32x256xf32>
    %181 = arith.mulf %142, %180 : vector<32x256xf32>
    %182 = arith.truncf %181 : vector<32x256xf32> to vector<32x256xbf16>
    %c0_70 = arith.constant 0 : index
    %c0_71 = arith.constant 0 : index
    %183 = vector.load %arg12[%c0_70, %c0_71] : memref<256x128xbf16, #tpu.memory_space<vmem>>, vector<256x128xbf16>
    %cst_72 = arith.constant dense<0.000000e+00> : vector<32x128xf32>
    %184 = tpu.matmul %182, %183, %cst_72 {dimension_numbers = #tpu.dot_dimension_numbers<[1], [0], [0], [1], [0, 0, 1, 1], [], []>} : vector<32x256xbf16>, vector<256x128xbf16>, vector<32x128xf32> -> vector<32x128xf32>
    %c0_73 = arith.constant 0 : index
    %c0_74 = arith.constant 0 : index
    %185 = vector.load %arg13[%c0_73, %c0_74] : memref<1x128xf32, #tpu.memory_space<vmem>>, vector<1x128xf32>
    %186 = vector.broadcast %185 : vector<1x128xf32> to vector<32x128xf32>
    %187 = arith.addf %184, %186 : vector<32x128xf32>
    %188 = arith.addf %112, %187 : vector<32x128xf32>
    %189 = vector.shape_cast %188 : vector<32x128xf32> to vector<4x8x128xf32>
    %c0_75 = arith.constant 0 : index
    %c0_76 = arith.constant 0 : index
    %c0_77 = arith.constant 0 : index
    %190 = vector.load %arg14[%c0_75, %c0_76, %c0_77] : memref<4x8x128xf32, #tpu.memory_space<vmem>>, vector<4x8x128xf32>
    tpu.vector_store %arg14[%c0_75, %c0_76, %c0_77], %189 {strides = array<i32>} : memref<4x8x128xf32, #tpu.memory_space<vmem>>, vector<4x8x128xf32>,
    return
  }
  func.func @transform_0(%arg0: i32) -> (i32, i32, i32) {
    %c0_i32 = arith.constant 0 : i32
    %c0_i32_0 = arith.constant 0 : i32
    %c0_i32_1 = arith.constant 0 : i32
    return %arg0, %c0_i32, %c0_i32_0 : i32, i32, i32
  }
  func.func @transform_1(%arg0: i32) -> (i32, i32) {
    %c0_i32 = arith.constant 0 : i32
    %c0_i32_0 = arith.constant 0 : i32
    %c0_i32_1 = arith.constant 0 : i32
    return %c0_i32, %c0_i32_0 : i32, i32
  }
  func.func @transform_2(%arg0: i32) -> (i32, i32) {
    %c0_i32 = arith.constant 0 : i32
    %c0_i32_0 = arith.constant 0 : i32
    %c0_i32_1 = arith.constant 0 : i32
    return %c0_i32, %c0_i32_0 : i32, i32
  }
  func.func @transform_3(%arg0: i32) -> (i32, i32) {
    %c0_i32 = arith.constant 0 : i32
    %c0_i32_0 = arith.constant 0 : i32
    %c0_i32_1 = arith.constant 0 : i32
    return %c0_i32, %c0_i32_0 : i32, i32
  }
  func.func @transform_4(%arg0: i32) -> (i32, i32) {
    %c0_i32 = arith.constant 0 : i32
    %c0_i32_0 = arith.constant 0 : i32
    %c0_i32_1 = arith.constant 0 : i32
    return %c0_i32, %c0_i32_0 : i32, i32
  }
  func.func @transform_5(%arg0: i32) -> (i32, i32) {
    %c0_i32 = arith.constant 0 : i32
    %c0_i32_0 = arith.constant 0 : i32
    %c0_i32_1 = arith.constant 0 : i32
    return %c0_i32, %c0_i32_0 : i32, i32
  }
  func.func @transform_6(%arg0: i32) -> (i32, i32) {
    %c0_i32 = arith.constant 0 : i32
    %c0_i32_0 = arith.constant 0 : i32
    %c0_i32_1 = arith.constant 0 : i32
    return %c0_i32, %c0_i32_0 : i32, i32
  }
  func.func @transform_7(%arg0: i32) -> (i32, i32) {
    %c0_i32 = arith.constant 0 : i32
    %c0_i32_0 = arith.constant 0 : i32
    %c0_i32_1 = arith.constant 0 : i32
    return %c0_i32, %c0_i32_0 : i32, i32
  }
  func.func @transform_8(%arg0: i32) -> (i32, i32) {
    %c0_i32 = arith.constant 0 : i32
    %c0_i32_0 = arith.constant 0 : i32
    %c0_i32_1 = arith.constant 0 : i32
    return %c0_i32, %c0_i32_0 : i32, i32
  }
  func.func @transform_9(%arg0: i32) -> (i32, i32) {
    %c0_i32 = arith.constant 0 : i32
    %c0_i32_0 = arith.constant 0 : i32
    %c0_i32_1 = arith.constant 0 : i32
    return %c0_i32, %c0_i32_0 : i32, i32
  }
  func.func @transform_10(%arg0: i32) -> (i32, i32) {
    %c0_i32 = arith.constant 0 : i32
    %c0_i32_0 = arith.constant 0 : i32
    %c0_i32_1 = arith.constant 0 : i32
    return %c0_i32, %c0_i32_0 : i32, i32
  }
  func.func @transform_11(%arg0: i32) -> (i32, i32) {
    %c0_i32 = arith.constant 0 : i32
    %c0_i32_0 = arith.constant 0 : i32
    %c0_i32_1 = arith.constant 0 : i32
    return %c0_i32, %c0_i32_0 : i32, i32
  }
  func.func @transform_12(%arg0: i32) -> (i32, i32) {
    %c0_i32 = arith.constant 0 : i32
    %c0_i32_0 = arith.constant 0 : i32
    %c0_i32_1 = arith.constant 0 : i32
    return %c0_i32, %c0_i32_0 : i32, i32
  }
  func.func @transform_13(%arg0: i32) -> (i32, i32, i32) {
    %c0_i32 = arith.constant 0 : i32
    %c0_i32_0 = arith.constant 0 : i32
    %c0_i32_1 = arith.constant 0 : i32
    return %arg0, %c0_i32, %c0_i32_0 : i32, i32, i32
  }
}

</mosaic_0001>

<bundles_post_ra>
// kernel: tpu_custom_call.1
= control target key start
LH: loop header
LB: loop body
LE: loop exit
PB: predicated region body
PF: predicated region fallthrough
CT: control target
= control target key end

     0   :  { %s5756_s0 = inlined_call_operand.hbm [shape: f32[8,8,128], index: 0, kind: input, shape index: {}]   ;;  %s5757_s1 = inlined_call_operand.hbm [shape: f32[1,128], index: 1, kind: input, shape index: {}]   ;;  %s5758_s2 = inlined_call_operand.hbm [shape: f32[1,128], index: 2, kind: input, shape index: {}]   ;;  %s5759_s3 = inlined_call_operand.hbm [shape: bf16[128,384], index: 3, kind: input, shape index: {}]   ;;  %s5760_s4 = inlined_call_operand.vmem [shape: f32[1,384], index: 4, kind: input, shape index: {}]   ;;  %s5761_s5 = inlined_call_operand.hbm [shape: bf16[128,128], index: 5, kind: input, shape index: {}]   ;;  %s5762_s6 = inlined_call_operand.vmem [shape: f32[1,128], index: 6, kind: input, shape index: {}]   ;;  %s5763_s7 = inlined_call_operand.vmem [shape: f32[1,128], index: 7, kind: input, shape index: {}]   ;;  %s5764_s8 = inlined_call_operand.vmem [shape: f32[1,128], index: 8, kind: input, shape index: {}]   ;;  %s5765_s9 = inlined_call_operand.hbm [shape: bf16[128,256], index: 9, kind: input, shape index: {}]   ;;  %s5766_s10 = inlined_call_operand.vmem [shape: f32[1,256], index: 10, kind: input, shape index: {}]   ;;  %s5767_s11 = inlined_call_operand.hbm [shape: bf16[256,128], index: 11, kind: input, shape index: {}]   ;;  %s5768_s12 = inlined_call_operand.vmem [shape: f32[1,128], index: 12, kind: input, shape index: {}]   ;;  %s5769_s13 = inlined_call_operand.hbm [shape: f32[8,8,128], index: 13, kind: output, shape index: {}]  }
   0x1   :  { %5776 = sst [smem:[#allocation21_spill]] %s5757_s1 }
   0x2   :  { %5777 = sst [smem:[#allocation22_spill]] %s5758_s2 }
   0x3   :  { %5778 = sst [smem:[#allocation23_spill]] %s5759_s3 }
   0x4   :  { %5779 = sst [smem:[#allocation24_spill]] %s5761_s5 }
   0x5   :  { %5780 = sst [smem:[#allocation25_spill]] %s5765_s9 }
   0x6   :  { %5781 = sst [smem:[#allocation26_spill]] %s5767_s11 }
   0x7   :  { %18 = vsyncpa [#allocation3], 0 }
   0x8   :  { %20 = vsyncpa [#allocation3 + $0x1], 0 }
   0x9   :  { %21 = vsyncpa [#allocation6], 0 }
   0xa   :  { %22 = vsyncpa [#allocation9], 0 }
   0xb   :  { %23 = vsyncpa [#allocation12], 0 }
   0xc   :  { %24 = vsyncpa [#allocation4], 0 }
   0xd   :  { %26 = vsyncpa [#allocation4 + $0x1], 0  ;;  %s4878_s25 = smov 0   ;;  %s4880_s26 = smov 0  }
   0xe   :  { %s4882_s27 = smov 0   ;;  %s4884_s28 = smov 0  }
   0xf LB: > { %s4785_s29 = smov [#allocation5]   ;;  %s4899_s14 = sadd.s32 4294967295, %s4783_s28   ;;  %s4783_s28 = sphi %s4884_s28, %s5815_s28   ;;  %s4779_s27 = sphi %s4882_s27, %s5814_s27   ;;  %s4775_s26 = sphi %s4880_s26, %s5813_s26   ;;  %s4771_s25 = sphi %s4878_s25, %s5812_s25  }
  0x10   : > { %s354_s30 = sshll.u32 %s4785_s29, 4  ;;  %p3678_p0 = scmp.ge.s32.totalorder %s4783_s28, 1  ;;  %s355_s30 = int_to_ptr.vmem [resolvable:$true] %s354_s30 }
  0x11   : > { %p5770_p1 = scmp.eq.s32.totalorder %s4899_s14, 0  ;;  %p341_p2 = scmp.lt.s32.totalorder %s4783_s28, 3 }
  0x12   : > { %s4786_s16 = smov [#allocation8]   ;;  %s4787_s19 = smov [#allocation11]  }
  0x13   : > { %p4904_p3 = pnand %p3678_p0, %p341_p2  ;;  %s375_s17 = sshll.u32 %s4786_s16, 4  ;;  %s4911_s17 = int_to_ptr.vmem [resolvable:$true] %s375_s17 }
  0x14   : > { %s413_s20 = sshll.u32 %s4787_s19, 4  ;;  %s4534_s22 = scalar_lea.vmem %s355_s30, 16  ;;  %s4919_s20 = int_to_ptr.vmem [resolvable:$true] %s413_s20 }
  0x15   : > { %s5782_s15 = scalar_select %p4904_p3, 1, 0 }
  0x16   : > { %p4203_p5 = pneg %p4904_p3  ;;  %p4535_p8 = scmp.ne.s32.totalorder %s355_s30, %s4534_s22 }
  0x17   : > { %s4541_s23 = scalar_lea.vmem %s355_s30, 32  ;;  %p4542_p11 = scmp.lt.s32.totalorder %s355_s30, %s355_s30 }
  0x18   : > { %p4915_p6 = pnand %p4203_p5, %p5770_p1  ;;  %p4543_p12 = scmp.lt.s32.totalorder %s4541_s23, %s4534_s22 }
  0x1a   : > { %p4923_p7 = pneg %p4915_p6  ;;  %p4544_p13 = por %p4543_p12, %p4542_p11 }
  0x1c   : > { %p4537_p9 = pnand %p4535_p8, %p4923_p7 }
  0x1e   : > { %p4538_p10 = pneg %p4537_p9 }
  0x20   : > { %p4545_p0 = pnand %p4544_p13, %p4538_p10 }
  0x22   : > { %4548 = shalt.err (!%p4545_p0)
}
  0x23   : > { %s5785_s1 = sld [smem:[#allocation21_spill]]  ;;  %s4560_s16 = scalar_lea.vmem %s4911_s17, 3072 }
  0x24   : > { %p4561_p2 = scmp.ne.s32.totalorder %s4911_s17, %s4560_s16  ;;  %p4568_p9 = scmp.lt.s32.totalorder %s4911_s17, %s4911_s17 }
  0x25   : > { %p4569_p11 = scmp.lt.s32.totalorder %s4560_s16, %s4560_s16 }
  0x26   : > { %p4563_p5 = pnand %p4561_p2, %p4923_p7 }
  0x27   : > { %p4570_p10 = por %p4569_p11, %p4568_p9 }
  0x28   : > { %p4564_p8 = pneg %p4563_p5 }
  0x29   : > { %4206 = dma.hbm_to_vmem [thread:$0]  (!%p4915_p6), %s5785_s1, 16, %s355_s30, [#allocation6]  }
  0x2a   : > { %p4571_p12 = pnand %p4570_p10, %p4564_p8 }
  0x2c   : > { %4574 = shalt.err (!%p4571_p12)
}
  0x2d   : > { %s4788_s19 = smov 192   ;;  %s4789_s22 = smov 12  }
  0x2e   : > { %s5786_s3 = sld [smem:[#allocation23_spill]]  ;;  %s4586_s24 = scalar_lea.vmem %s4919_s20, 2048 }
  0x2f   : > { %p4587_p13 = scmp.ne.s32.totalorder %s4919_s20, %s4586_s24  ;;  %p4594_p5 = scmp.lt.s32.totalorder %s4919_s20, %s4919_s20 }
  0x30   : > { %p4595_p8 = scmp.lt.s32.totalorder %s4586_s24, %s4586_s24 }
  0x31   : > { %p4589_p0 = pnand %p4587_p13, %p4923_p7 }
  0x32   : > { %p4596_p9 = por %p4595_p8, %p4594_p5 }
  0x33   : > { %p4590_p2 = pneg %p4589_p0 }
  0x34   : > { %4212 = dma.hbm_to_vmem [thread:$0]  (!%p4915_p6), %s5786_s3, 3072, %s4911_s17, [#allocation9], %s4788_s19, %s4788_s19, %s4789_s22  }
  0x35   : > { %p4597_p11 = pnand %p4596_p9, %p4590_p2 }
  0x37   : > { %4600 = shalt.err (!%p4597_p11)
}
  0x38   : > { %s5772_s29 = smov 128   ;;  %s5773_s16 = smov 8  }
  0x39   : > { %s5787_s9 = sld [smem:[#allocation25_spill]]  ;;  %s4792_s22 = smov [#allocation7]  }
  0x3a   : > { %s365_s30 = sshll.u32 %s4792_s22, 4  ;;  %s4793_s23 = smov [#allocation10]   ;;  %s366_s30 = int_to_ptr.vmem [resolvable:$true] %s365_s30 }
  0x3b   : > { %s391_s24 = sshll.u32 %s4793_s23, 4  ;;  %s4612_s1 = scalar_lea.vmem %s366_s30, 16  ;;  %s392_s24 = int_to_ptr.vmem [resolvable:$true] %s391_s24 }
  0x3c   : > { %p4613_p10 = scmp.ne.s32.totalorder %s366_s30, %s4612_s1  ;;  %s4619_s3 = scalar_lea.vmem %s366_s30, 32 }
  0x3d   : > { %p4620_p0 = scmp.lt.s32.totalorder %s366_s30, %s366_s30  ;;  %p4621_p2 = scmp.lt.s32.totalorder %s4619_s3, %s4612_s1 }
  0x3e   : > { %p4615_p12 = pnand %p4613_p10, %p4923_p7 }
  0x3f   : > { %4218 = dma.hbm_to_vmem [thread:$0]  (!%p4915_p6), %s5787_s9, 2048, %s4919_s20, [#allocation12], %s5772_s29, %s5772_s29, %s5773_s16  }
  0x40   : > { %p4616_p13 = pneg %p4615_p12  ;;  %p4622_p5 = por %p4621_p2, %p4620_p0 }
  0x42   : > { %p4623_p8 = pnand %p4622_p5, %p4616_p13 }
  0x44   : > { %4626 = shalt.err (!%p4623_p8)
}
  0x45   : > { %s5788_s2 = sld [smem:[#allocation22_spill]]  ;;  %s4638_s19 = scalar_lea.vmem %s392_s24, 1024 }
  0x46   : > { %p4639_p9 = scmp.ne.s32.totalorder %s392_s24, %s4638_s19  ;;  %p4646_p12 = scmp.lt.s32.totalorder %s392_s24, %s392_s24 }
  0x47   : > { %p4647_p4 = scmp.lt.s32.totalorder %s4638_s19, %s4638_s19 }
  0x48   : > { %p4641_p11 = pnand %p4639_p9, %p4923_p7 }
  0x49   : > { %p4648_p1 = por %p4647_p4, %p4646_p12 }
  0x4a   : > { %p4642_p10 = pneg %p4641_p11 }
  0x4b   : > { %4209 = dma.hbm_to_vmem [thread:$0]  (!%p4915_p6), %s5788_s2, 16, %s366_s30, [#allocation6]  }
  0x4c   : > { %p4649_p3 = pnand %p4648_p1, %p4642_p10 }
  0x4e   : > { %4652 = shalt.err (!%p4649_p3)
}
  0x4f   : > { %s4794_s1 = smov 64   ;;  %s4795_s3 = smov 4  }
  0x50   : > { %s5789_s5 = sld [smem:[#allocation24_spill]]  ;;  %s4796_s30 = smov [#allocation13]  }
  0x51   : > { %s429_s17 = sshll.u32 %s4796_s30, 4  ;;  %s430_s17 = int_to_ptr.vmem [resolvable:$true] %s429_s17 }
  0x52   : > { %s4664_s20 = scalar_lea.vmem %s430_s17, 2048  ;;  %p4672_p4 = scmp.lt.s32.totalorder %s430_s17, %s430_s17 }
  0x53   : > { %p4665_p13 = scmp.ne.s32.totalorder %s430_s17, %s4664_s20  ;;  %p4673_p1 = scmp.lt.s32.totalorder %s4664_s20, %s4664_s20 }
  0x55   : > { %p4667_p0 = pnand %p4665_p13, %p4923_p7  ;;  %p4674_p3 = por %p4673_p1, %p4672_p4 }
  0x56   : > { %4215 = dma.hbm_to_vmem [thread:$0]  (!%p4915_p6), %s5789_s5, 1024, %s392_s24, [#allocation9], %s4794_s1, %s4794_s1, %s4795_s3  }
  0x57   : > { %p4668_p2 = pneg %p4667_p0 }
  0x59   : > { %p4675_p5 = pnand %p4674_p3, %p4668_p2 }
  0x5b   : > { %4678 = shalt.err (!%p4675_p5)
}
  0x5c   : > { %s5790_s11 = sld [smem:[#allocation26_spill]]  ;;  %s3677_s21 = sadd.s32 4294967294, %s4783_s28  }
  0x5d   : > { %s4984_s18 = sadd.s32 1, %s4783_s28   ;;  %s39_s24 = sadd.s32 1, %s4779_s27 }
  0x5e   : > { %s36_s29 = ssub.s32 %s4783_s28, %s4984_s18  ;;  %p46_p8 = scmp.ne.s32.totalorder %s4779_s27, %s4775_s26 }
  0x5f   : > { %p37_p7 = scmp.eq.s32.totalorder %s36_s29, 0  ;;  %p47_p9 = scmp.eq.s32.totalorder %s4783_s28, 0 }
  0x60   : > { %p52_p11 = scmp.ne.s32.totalorder %s4775_s26, %s4771_s25  ;;  %p5793_p12 = scmp.eq.s32.totalorder %s4899_s14, 0 }
  0x61   : > { %s4995_s22 = scalar_select %p37_p7, %s4779_s27, %s39_s24  }
  0x62   : > { %4221 = dma.hbm_to_vmem [thread:$0]  (!%p4915_p6), %s5790_s11, 2048, %s430_s17, [#allocation12], %s4794_s1, %s4794_s1, %s4795_s3  }
  0x63   : > { %5791 = sst [smem:[#allocation20_spill]] %s4995_s22  ;;  %p4997_p10 = por %p47_p9, %p46_p8 }
  0x64   : > { %p5003_p6 = por %p5793_p12, %p52_p11  ;;  %p328_p13 = scmp.eq.s32.totalorder %s4899_s14, 1 }
  0x65   : > { %p334_p0 = scmp.eq.s32.totalorder %s3677_s21, 1  ;;  %p4236_p2 = scmp.lt.s32.totalorder %s4783_s28, 2 }
  0x66   : > { %s5794_s1 = scalar_select %p5003_p6, 1, 0 }
  0x67   : > { %s446_s3 = sand.u32 1, %s4779_s27   ;;  %p5010_p4 = por %p328_p13, %p46_p8 }
  0x68   : > { %p5014_p1 = por %p334_p0, %p52_p11  ;;  %s3686_s20 = sshll.u32 %s446_s3, 5 }
  0x69   : > { %s5795_s30 = scalar_select %p5010_p4, 1, 0 }
  0x6a   : > { %s5796_s17 = scalar_select %p5014_p1, 1, 0 }
  0x6b   : > { %s3817_s19 = sshll.u32 %s4783_s28, 9  ;;  %s450_s21 = scalar_lea.vmem [#allocation2], %s3686_s20 }
  0x6c   : > { %s5022_s16 = scalar_lea.hbm %s5756_s0, %s3817_s19  ;;  %s457_s2 = sshll.u32 %s450_s21, 4  ;;  %s5024_s2 = int_to_ptr.vmem [resolvable:$true] %s457_s2 }
  0x6d   : > { %p5028_p3 = pnand %p4236_p2, %p4997_p10  ;;  %s5032_s9 = scalar_lea.sflag [#allocation3], %s446_s3 }
  0x6e   : > { %s4679_s11 = scalar_lea.hbm %s5022_s16, 512  ;;  %s4684_s20 = scalar_lea.hbm %s5756_s0, 1024 }
  0x6f   : > { %p4680_p5 = scmp.ne.s32.totalorder %s5022_s16, %s4679_s11  ;;  %p4681_p7 = pneg %p5028_p3 }
  0x70   : > { %p4685_p11 = scmp.lt.s32.totalorder %s5022_s16, %s5756_s0  ;;  %p4686_p10 = scmp.lt.s32.totalorder %s4684_s20, %s4679_s11 }
  0x71   : > { %p4682_p8 = pnand %p4681_p7, %p4680_p5 }
  0x72   : > { %p4687_p12 = por %p4686_p10, %p4685_p11 }
  0x73   : > { %p4683_p9 = pneg %p4682_p8 }
  0x75   : > { %p4688_p13 = pnand %p4687_p12, %p4683_p9 }
  0x77   : > { %4691 = shalt.err (!%p4688_p13)
}
  0x78   : > { %s4692_s23 = scalar_lea.vmem %s5024_s2, 512  ;;  %s4797_s3 = smov [#allocation2]  }
  0x79   : > { %p4693_p0 = scmp.ne.s32.totalorder %s5024_s2, %s4692_s23  ;;  %s4697_s22 = sshll.u32 %s4797_s3, 4  ;;  %s4698_s22 = int_to_ptr.vmem [resolvable:$false] %s4697_s22 }
  0x7a   : > { %s4699_s19 = scalar_lea.vmem %s4698_s22, 1024  ;;  %p4700_p8 = scmp.lt.s32.totalorder %s5024_s2, %s4698_s22 }
  0x7b   : > { %p4695_p2 = pnand %p4693_p0, %p4681_p7  ;;  %p4701_p1 = scmp.lt.s32.totalorder %s4699_s19, %s4692_s23 }
  0x7d   : > { %p4696_p5 = pneg %p4695_p2  ;;  %p4702_p4 = por %p4701_p1, %p4700_p8 }
  0x7f   : > { %p4703_p6 = pnand %p4702_p4, %p4696_p5 }
  0x81   : > { %4706 = shalt.err (!%p4703_p6)
}
  0x82   : > { %s5798_s11 = smov 8   ;;  %s5799_s29 = smov 128  }
  0x83   : > { %4225 = dma.hbm_to_vmem [thread:$0]  (!%p5028_p3), %s5022_s16, 512, %s5024_s2, %s5032_s9, %s5799_s29, %s5799_s29, %s5798_s11  }
  0x84   : > { %p5800_p7 = scmp.ne.s32.totalorder %s5782_s15, 0 }
  0x85   : > { %s5059_s20 = sand.u32 (!%p5800_p7), 1, %s4775_s26   ;;  %p5801_p6 = scmp.ne.s32.totalorder (!%p5800_p7), %s5794_s1, 0 }
  0x86   : > { %469 = sbr.rel (%p5800_p7) target bundleno = 4272 (0x10b0), region = 72  ;;  %s3690_s22 = sshll.u32 (!%p5800_p7), %s5059_s20, 5 }
  0x87   : > { %s472_s24 = scalar_lea.sflag (!%p5800_p7), [#allocation3], %s5059_s20  ;;  %s5065_s5 = scalar_lea.vmem (!%p5800_p7), [#allocation2], %s3690_s22 }
  0x8b   : > { %4750 = dma.done.wait (%p5801_p6), %s472_s24, 512  }
  0x8c   : > { %4752 = vsyncadd (%p5801_p6), %s472_s24, 4294966784  ;;  %p5802_p4 = scmp.eq.s32.totalorder %s4899_s14, 0 }
  0x8e   : > { %4754 = dma.done.wait (%p5802_p4), [#allocation6], 32   ;;  %p5803_p1 = pmov %p5802_p4 }
  0x90   : > { %4756 = vsyncadd (%p5803_p1), [#allocation6], 4294967264  ;;  %p5804_p3 = pmov %p5803_p1 }
  0x91   : > { %p5805_p9 = pmov %p5803_p1 }
  0x92   : > { %4758 = dma.done.wait (%p5804_p3), [#allocation9], 4096  }
  0x93   : > { %4760 = vsyncadd (%p5805_p9), [#allocation9], 4294963200  ;;  %p5806_p11 = pmov %p5803_p1 }
  0x94   : > { %p5807_p10 = pmov %p5803_p1 }
  0x95   : > { %4762 = dma.done.wait (%p5806_p11), [#allocation12], 4096  }
  0x96   : > { %4764 = vsyncadd (%p5807_p10), [#allocation12], 4294963200  ;;  %v545_v0 = vld [vmem:[%s5065_s5] sm:$0xff]  ;;  %v547_v1 = vld [vmem:[%s5065_s5 + $0x10] sm:$0xff]  ;;  %v4798_v39 = vmov 0   ;;  %vm4800_vm0 = vmmov 0  }
  0x97   : > { %v546_v2 = vld [vmem:[%s5065_s5 + $0x8] sm:$0xff]  ;;  %551 = vadd.xlane.f32.xlu0 %v545_v0  ;;  %555 = vadd.xlane.f32.xlu1 %v547_v1  ;;  %v548_v3 = vld [vmem:[%s5065_s5 + $0x18] sm:$0xff]  ;;  %v4332_v23 = vld [vmem:[#allocation8 + $0xb0] ss:$12 sps:$4 sm:$0xff]   ;;  %vm930_vm1 = vcmask 261120   ;;  %vm1174_vm2 = vcmask 1043456  }
  0x98   : > { %v4327_v4 = vld [vmem:[#allocation8 + $0xac] ss:$12 sps:$4 sm:$0xff]   ;;  %v4329_v5 = vld [vmem:[#allocation8 + $0xa8] ss:$12 sps:$4 sm:$0xff]   ;;  %v4333_v24 = vld [vmem:[#allocation8 + $0x90] ss:$12 sps:$4 sm:$0xff]   ;;  %3943 = vmatprep.subr.bf16.mxu1 %v4332_v23  ;;  %827 = vmatprep.mubr.bf16.mxu0 %v4798_v39 }
  0x99   : > { %795 = vmatprep.subr.bf16.mxu0 %v4327_v4  ;;  %v4330_v22 = vld [vmem:[#allocation8 + $0x94] ss:$12 sps:$4 sm:$0xff]   ;;  %3944 = vmatpush3.bf16.msra.mxu1 %v4332_v23  ;;  %v4334_v25 = vld [vmem:[#allocation8 + $0x7c] ss:$12 sps:$4 sm:$0xff]   ;;  %v4336_v26 = vld [vmem:[#allocation8 + $0x98] ss:$12 sps:$4 sm:$0xff]  }
  0x9a   : > { %796 = vmatpush1.bf16.msra.mxu0 %v4329_v5  ;;  %v4337_v27 = vld [vmem:[#allocation8 + $0x78] ss:$12 sps:$4 sm:$0xff]   ;;  %3945 = vmatprep.subr.bf16.mxu1 %v4336_v26  ;;  %v4340_v29 = vld [vmem:[#allocation8 + $0x80] ss:$12 sps:$4 sm:$0xff]   ;;  %v4344_v32 = vld [vmem:[#allocation8 + $0x68] ss:$12 sps:$4 sm:$0xff]  }
  0x9b   : > { %553 = vadd.xlane.f32.xlu0 %v546_v2  ;;  %557 = vadd.xlane.f32.xlu1 %v548_v3  ;;  %v4338_v28 = vld [vmem:[#allocation8 + $0x64] ss:$12 sps:$4 sm:$0xff]   ;;  %v4341_v30 = vld [vmem:[#allocation8 + $0x60] ss:$12 sps:$4 sm:$0xff]   ;;  %v4345_v33 = vld [vmem:[#allocation8 + $0x48] ss:$12 sps:$4 sm:$0xff]  }
  0x9c   : > { %797 = vmatprep.subr.bf16.mxu0 %v4330_v22  ;;  %v4342_v31 = vld [vmem:[#allocation8 + $0x4c] ss:$12 sps:$4 sm:$0xff]   ;;  %v4346_v34 = vld [vmem:[#allocation8 + $0x34] ss:$12 sps:$4 sm:$0xff]   ;;  %v4348_v35 = vld [vmem:[#allocation8 + $0x50] ss:$12 sps:$4 sm:$0xff]  }
  0x9d   : > { %3946 = vmatpush3.bf16.msra.mxu1 %v4336_v26  ;;  %v4349_v36 = vld [vmem:[#allocation8 + $0x30] ss:$12 sps:$4 sm:$0xff]   ;;  %v4352_v38 = vld [vmem:[#allocation8 + $0x38] ss:$12 sps:$4 sm:$0xff]   ;;  %v4356_v42 = vld [vmem:[#allocation8 + $0x20] ss:$12 sps:$4 sm:$0xff]  }
  0x9e   : > { %798 = vmatpush1.bf16.msra.mxu0 %v4333_v24  ;;  %3947 = vmatprep.subr.bf16.mxu1 %v4340_v29  ;;  %v4350_v37 = vld [vmem:[#allocation8 + $0x1c] ss:$12 sps:$4 sm:$0xff]   ;;  %v4353_v40 = vld [vmem:[#allocation8 + $0x18] ss:$12 sps:$4 sm:$0xff]   ;;  %v4357_v43 = vld [vmem:[#allocation8] ss:$12 sps:$4 sm:$0xff]  }
  0x9f   : > { %799 = vmatprep.subr.bf16.mxu0 %v4334_v25  ;;  %v4354_v41 = vld [vmem:[#allocation8 + $0x4] ss:$12 sps:$4 sm:$0xff]   ;;  %v4358_v44 = vld [vmem:[#allocation8 + $0x8] ss:$12 sps:$4 sm:$0xff]   ;;  %v3698_v59 = vld [vmem:[#allocation5] ss:$0 sm:$0xff] }
  0xa0   : > { %vm1122_vm3 = vcmask 64512   ;;  %s4801_s15 = smov 96   ;;  %s4802_s16 = smov 64   ;;  %vm2756_vm4 = vcmask 523264   ;;  %vm2761_vm5 = vcmask 785408  }
  0xa1   : > { %3948 = vmatpush3.bf16.msra.mxu1 %v4340_v29  ;;  %s4803_s1 = smov 32   ;;  %s3534_s3 = scalar_lea.sflag [#allocation4], %s5059_s20 }
  0xa2   : > { %800 = vmatpush1.bf16.msra.mxu0 %v4337_v27  ;;  %3949 = vmatprep.subr.bf16.mxu1 %v4344_v32  ;;  %p5808_p13 = scmp.ne.s32.totalorder %s5795_s30, 0 }
  0xa3   : > { %801 = vmatprep.subr.bf16.mxu0 %v4338_v28 }
  0xa5   : > { %3950 = vmatpush3.bf16.msra.mxu1 %v4344_v32 }
  0xa6   : > { %802 = vmatpush1.bf16.msra.mxu0 %v4341_v30  ;;  %3951 = vmatprep.subr.bf16.mxu1 %v4348_v35 }
  0xa7   : > { %803 = vmatprep.subr.bf16.mxu0 %v4342_v31 }
  0xa9   : > { %3952 = vmatpush3.bf16.msra.mxu1 %v4348_v35 }
  0xaa   : > { %804 = vmatpush1.bf16.msra.mxu0 %v4345_v33  ;;  %3953 = vmatprep.subr.bf16.mxu1 %v4352_v38 }
  0xab   : > { %805 = vmatprep.subr.bf16.mxu0 %v4346_v34 }
  0xad   : > { %3954 = vmatpush3.bf16.msra.mxu1 %v4352_v38 }
  0xae   : > { %806 = vmatpush1.bf16.msra.mxu0 %v4349_v36  ;;  %3955 = vmatprep.subr.bf16.mxu1 %v4356_v42 }
  0xaf   : > { %807 = vmatprep.subr.bf16.mxu0 %v4350_v37 }
  0xb1   : > { %3956 = vmatpush3.bf16.msra.mxu1 %v4356_v42 }
  0xb2   : > { %808 = vmatpush1.bf16.msra.mxu0 %v4353_v40  ;;  %3957 = vmatprep.subr.bf16.mxu1 %v4358_v44 }
  0xb3   : > { %809 = vmatprep.subr.bf16.mxu0 %v4354_v41 }
  0xb5   : > { %3958 = vmatpush3.bf16.msra.mxu1 %v4358_v44 }
  0xb6   : > { %810 = vmatpush1.bf16.msra.mxu0 %v4357_v43 }
 0x120   : > { %v552_v6 = vpop.xlane.xlu0 %551  ;;  %v556_v7 = vpop.xlane.xlu1 %555 }
 0x121   : > { %v560_v8 = vmul.f32 0.0078125, %v552_v6  ;;  %v562_v9 = vmul.f32 0.0078125, %v556_v7 }
 0x123   : > { %v5087_v10 = vsub.f32 %v545_v0, %v560_v8  ;;  %v5089_v11 = vsub.f32 %v547_v1, %v562_v9  ;;  %v3699_v0 = vld [vmem:[#allocation7] ss:$0 sm:$0xff] }
 0x124   : > { %v554_v12 = vpop.xlane.xlu0 %553  ;;  %v558_v13 = vpop.xlane.xlu1 %557 }
 0x125   : > { %v561_v14 = vmul.f32 0.0078125, %v554_v12  ;;  %v568_v15 = vmul.f32 %v5087_v10, %v5087_v10  ;;  %v563_v16 = vmul.f32 0.0078125, %v558_v13  ;;  %v570_v19 = vmul.f32 %v5089_v11, %v5089_v11 }
 0x127   : > { %v5093_v17 = vsub.f32 %v546_v2, %v561_v14  ;;  %572 = vadd.xlane.f32.xlu0 %v568_v15  ;;  %v5095_v18 = vsub.f32 %v548_v3, %v563_v16  ;;  %v4799_v14 = vmov 0.0  }
 0x128   : > { %3963 = vmatprep.subr.bf16.mxu0 %v4799_v14  ;;  %3975 = vmatprep.subr.bf16.mxu1 %v4799_v14 }
 0x129   : > { %v569_v20 = vmul.f32 %v5093_v17, %v5093_v17  ;;  %v571_v21 = vmul.f32 %v5095_v18, %v5095_v18 }
 0x12b   : > { %576 = vadd.xlane.f32.xlu0 %v570_v19  ;;  %574 = vadd.xlane.f32.xlu1 %v569_v20 }
 0x12f   : > { %578 = vadd.xlane.f32.xlu1 %v571_v21 }
 0x1b0   : > { %v573_v45 = vpop.xlane.xlu0 %572 }
 0x1b1   : > { %v580_v46 = vmul.f32 0.0078125, %v573_v45 }
 0x1b3   : > { %v584_v47 = vadd.f32 1e-05, %v580_v46 }
 0x1b4   : > { %v575_v48 = vpop.xlane.xlu1 %574  ;;  %v577_v49 = vpop.xlane.xlu0 %576 }
 0x1b5   : > { %4407 = vrsqrt.f32 %v584_v47  ;;  %v581_v50 = vmul.f32 0.0078125, %v575_v48  ;;  %v582_v51 = vmul.f32 0.0078125, %v577_v49 }
 0x1b7   : > { %v585_v52 = vadd.f32 1e-05, %v581_v50  ;;  %v586_v53 = vadd.f32 1e-05, %v582_v51 }
 0x1b8   : > { %v579_v54 = vpop.xlane.xlu1 %578 }
 0x1b9   : > { %4409 = vrsqrt.f32 %v585_v52  ;;  %v583_v55 = vmul.f32 0.0078125, %v579_v54 }
 0x1ba   : > { %4411 = vrsqrt.f32 %v586_v53 }
 0x1bb   : > { %v587_v56 = vadd.f32 1e-05, %v583_v55 }
 0x1bd   : > { %4413 = vrsqrt.f32 %v587_v56 }
 0x1c2   : > { %v4408_v57 = vpop.eup %4407 }
 0x1c3   : > { %v592_v58 = vmul.f32 %v4408_v57, %v5087_v10 }
 0x1c5   : > { %v602_v63 = vmul.f32 %v3698_v59, %v592_v58 }
 0x1c6   : > { %v4410_v60 = vpop.eup %4409 }
 0x1c7   : > { %v4412_v61 = vpop.eup %4411  ;;  %v593_v62 = vmul.f32 %v4410_v60, %v5093_v17  ;;  %v612_v4 = vadd.f32 %v3699_v0, %v602_v63 }
 0x1c8   : > { %v594_v1 = vmul.f32 %v4412_v61, %v5089_v11  ;;  %v652_v11 = vlaneseq }
 0x1c9   : > { %v603_v2 = vmul.f32 %v3698_v59, %v593_v62 }
 0x1ca   : > { %v4414_v3 = vpop.eup %4413  ;;  %v604_v7 = vmul.f32 %v3698_v59, %v594_v1  ;;  %v5115_v15 = vshrl.u32 %v652_v11, 7 }
 0x1cb   : > { %v613_v5 = vadd.f32 %v3699_v0, %v603_v2  ;;  %v595_v6 = vmul.f32 %v4414_v3, %v5095_v18  ;;  %v650_v18 = vld [vmem:[%s5760_s4] sm:$0x7] }
 0x1cc   : > { %v614_v10 = vadd.f32 %v3699_v0, %v604_v7  ;;  %v654_v16 = vsub.s32 0, %v5115_v15  ;;  %v658_v17 = vsub.s32 1, %v5115_v15  ;;  %v662_v19 = vsub.s32 2, %v5115_v15 }
 0x1cd   : > { %v616_v8 = vpack.c.bf16 %v613_v5, %v612_v4  ;;  %v605_v9 = vmul.f32 %v3698_v59, %v595_v6 }
 0x1ce   : > { %v655_v20 = vrot.slane %v650_v18, %v654_v16  ;;  %v659_v21 = vrot.slane %v650_v18, %v658_v17  ;;  %v663_v23 = vrot.slane %v650_v18, %v662_v19 }
 0x1cf   : > { %828 = vmatmul.mubr.bf16.vlgmr.msra.gmra.mxu0 %v616_v8  ;;  %3959 = vmatprep.mubr.bf16.mxu1 %v616_v8  ;;  %v615_v12 = vadd.f32 %v3699_v0, %v605_v9 }
 0x1d0   : > { %837 = vmatprep.mubr.bf16.mxu0 %v4798_v39 }
 0x1d1   : > { %v617_v13 = vpack.c.bf16 %v615_v12, %v614_v10 }
 0x1d3   : > { %3960 = vmatmul.mubr.bf16.vlgmr.msra.gmra.mxu1 %v617_v13 }
 0x1d4   : > { %3977 = vmatprep.mubr.msk.bf16.mxu1 %vm4800_vm0, %v4799_v14 }
 0x1d7   : > { %838 = vmatmul.mubr.bf16.gmra.mxu0 %v617_v13 }
 0x1d8   : > { %3965 = vmatprep.mubr.msk.bf16.mxu0 %vm4800_vm0, %v4799_v14 }
 0x28f   : > { %v829_v22 = vpop.f32.mrf.mxu0 }
 0x290   : > { %v5127_v25 = vadd.f32 %v829_v22, %v655_v20 }
 0x291   : > { %v831_v24 = vpop.f32.mrf.mxu0 }
 0x292   : > { %v832_v26 = vadd.f32 %v831_v24, %v659_v21 }
 0x293   : > { %v833_v27 = vpop.f32.mrf.mxu0  ;;  %v3961_v28 = vpop.f32.mrf.mxu1 }
 0x294   : > { %v5130_v29 = vpack.c.bf16 %v832_v26, %v5127_v25  ;;  %v5132_v30 = vadd.f32 %v3961_v28, %v663_v23  ;;  %v5134_v34 = vadd.f32 %v833_v27, %v655_v20 }
 0x295   : > { %v835_v31 = vpop.f32.mrf.mxu0  ;;  %v882_v32 = vpop.f32.mrf.mxu1 }
 0x296   : > { %v836_v33 = vadd.f32 %v835_v31, %v659_v21  ;;  %v929_v37 = vrot.slane %v5130_v29, 4  ;;  %v883_v52 = vadd.f32 %v882_v32, %v663_v23 }
 0x297   : > { %v839_v35 = vpop.f32.mrf.mxu0  ;;  %v3962_v36 = vpop.f32.mrf.mxu1 }
 0x298   : > { %v5137_v38 = vadd.f32 %v3962_v36, %v663_v23  ;;  %v5140_v40 = vpack.c.bf16 %v836_v33, %v5134_v34  ;;  %v935_v42 = vsel %vm930_vm1, %v929_v37, 0  ;;  %v5143_v43 = vadd.f32 %v839_v35, %v655_v20 }
 0x299   : > { %v841_v41 = vpop.f32.mrf.mxu0  ;;  %3964 = vmatpush3.bf16.xpose.msra.mxu0 %v935_v42  ;;  %v5164_v56 = vpack.c.bf16 %v883_v52, %v883_v52  ;;  %v885_v58 = vpop.f32.mrf.mxu1 }
 0x29a   : > { %v842_v44 = vadd.f32 %v841_v41, %v659_v21  ;;  %3969 = vmatprep.subr.bf16.mxu0 %v4799_v14  ;;  %v977_v48 = vrot.slane %v5140_v40, 4  ;;  %v886_v60 = vadd.f32 %v885_v58, %v663_v23 }
 0x29b   : > { %v843_v45 = vpop.f32.mrf.mxu0  ;;  %v1176_v59 = vsel %vm1174_vm2, %v5164_v56, 0 }
 0x29c   : > { %v5147_v46 = vpack.c.bf16 %v842_v44, %v5143_v43  ;;  %v5151_v51 = vadd.f32 %v843_v45, %v655_v20  ;;  %v982_v55 = vsel %vm930_vm1, %v977_v48, 0  ;;  %v5180_v62 = vpack.c.bf16 %v886_v60, %v886_v60 }
 0x29d   : > { %v845_v47 = vpop.f32.mrf.mxu0 }
 0x29e   : > { %v846_v49 = vadd.f32 %v845_v47, %v659_v21  ;;  %v1024_v50 = vrot.slane %v5147_v46, 4  ;;  %v1222_v63 = vsel %vm1174_vm2, %v5180_v62, 0 }
 0x2a0   : > { %v1029_v53 = vsel %vm930_vm1, %v1024_v50, 0  ;;  %v5155_v54 = vpack.c.bf16 %v846_v49, %v5151_v51  ;;  %3966 = vmatmul.mubr.msk.bf16.vlgmr.msra.gmra.mxu0 %vm930_vm1, %v5130_v29 }
 0x2a1   : > { %3976 = vmatpush3.bf16.xpose.msra.mxu1 %v1029_v53  ;;  %3970 = vmatpush3.bf16.xpose.msra.mxu0 %v982_v55  ;;  %v5204_v53 = vpack.c.bf16 %v5127_v25, %v5127_v25  ;;  %v5210_v55 = vpack.c.bf16 %v5143_v43, %v5143_v43  ;;  %v5219_v25 = vpack.c.bf16 %v5134_v34, %v5134_v34 }
 0x2a2   : > { %3971 = vmatprep.mubr.msk.bf16.mxu0 %vm4800_vm0, %v4799_v14  ;;  %3981 = vmatprep.subr.bf16.mxu0 %v4799_v14  ;;  %v1071_v57 = vrot.slane %v5155_v54, 4  ;;  %v5225_v43 = vpack.c.bf16 %v5151_v51, %v5151_v51  ;;  %v5231_v34 = vpack.c.bf16 %v5132_v30, %v5132_v30  ;;  %v5241_v30 = vpack.c.bf16 %v5137_v38, %v5137_v38 }
 0x2a3   : > { %3987 = vmatprep.subr.bf16.mxu1 %v4799_v14 }
 0x2a4   : > { %v1076_v61 = vsel %vm930_vm1, %v1071_v57, 0  ;;  %v1268_v51 = vsel %vm1174_vm2, %v5231_v34, 0 }
 0x2a8   : > { %3978 = vmatmul.mubr.msk.bf16.vlgmr.msra.gmra.mxu1 %vm930_vm1, %v5147_v46  ;;  %3972 = vmatmul.mubr.msk.bf16.vlgmr.msra.gmra.mxu0 %vm930_vm1, %v5140_v40 }
 0x2a9   : > { %3988 = vmatpush3.bf16.msra.mxu1 %v1176_v59  ;;  %3982 = vmatpush3.bf16.xpose.msra.mxu0 %v1076_v61 }
 0x2aa   : > { %3983 = vmatprep.mubr.msk.bf16.mxu0 %vm4800_vm0, %v4799_v14  ;;  %3993 = vmatprep.subr.bf16.mxu0 %v4799_v14 }
 0x2ab   : > { %3989 = vmatprep.mubr.msk.bf16.mxu1 %vm4800_vm0, %v4799_v14  ;;  %3999 = vmatprep.subr.bf16.mxu1 %v4799_v14 }
 0x2b0   : > { %3984 = vmatmul.mubr.msk.bf16.vlgmr.msra.gmra.mxu0 %vm930_vm1, %v5155_v54 }
 0x2b1   : > { %3994 = vmatpush3.bf16.msra.mxu0 %v1222_v63  ;;  %3995 = vmatprep.mubr.msk.bf16.mxu0 %vm4800_vm0, %v4799_v14 }
 0x2b2   : > { %4005 = vmatprep.subr.bf16.mxu0 %v4799_v14 }
 0x360   : > { %v971_v0 = vpop.f32.mrf.mxu0 }
 0x361   : > { %v1118_v1 = vmul.f32 0.17677669, %v971_v0 }
 0x362   : > { %v3967_v2 = vpop.f32.mrf.mxu0 }
 0x363   : > { %v1123_v3 = vsel %vm1122_vm3, %v1118_v1, -inf }
 0x364   : > { %1124 = vmax.xlane.f32.xlu0 %v1123_v3  ;;  %v974_v4 = vpop.f32.mrf.mxu0 }
 0x366   : > { %v3968_v5 = vpop.f32.mrf.mxu0 }
 0x368   : > { %v1065_v6 = vpop.f32.mrf.mxu1  ;;  %v1018_v7 = vpop.f32.mrf.mxu0 }
 0x369   : > { %v1120_v8 = vmul.f32 0.17677669, %v1065_v6  ;;  %v1119_v9 = vmul.f32 0.17677669, %v1018_v7 }
 0x36a   : > { %v3979_v10 = vpop.f32.mrf.mxu1  ;;  %v3973_v12 = vpop.f32.mrf.mxu0 }
 0x36b   : > { %v1129_v13 = vsel %vm1122_vm3, %v1120_v8, -inf  ;;  %v1126_v11 = vsel %vm1122_vm3, %v1119_v9, -inf }
 0x36c   : > { %1130 = vmax.xlane.f32.xlu0 %v1129_v13  ;;  %v1068_v18 = vpop.f32.mrf.mxu1  ;;  %1127 = vmax.xlane.f32.xlu1 %v1126_v11  ;;  %v1021_v19 = vpop.f32.mrf.mxu0 }
 0x36d   : > { %v1314_v19 = vsel %vm1174_vm2, %v5241_v30, 0 }
 0x36e   : > { %v3980_v20 = vpop.f32.mrf.mxu1  ;;  %v3974_v21 = vpop.f32.mrf.mxu0 }
 0x370   : > { %v1112_v22 = vpop.f32.mrf.mxu0 }
 0x371   : > { %v1121_v23 = vmul.f32 0.17677669, %v1112_v22 }
 0x372   : > { %v3985_v24 = vpop.f32.mrf.mxu0 }
 0x373   : > { %v1132_v26 = vsel %vm1122_vm3, %v1121_v23, -inf }
 0x374   : > { %1133 = vmax.xlane.f32.xlu1 %v1132_v26  ;;  %v1115_v27 = vpop.f32.mrf.mxu0 }
 0x376   : > { %v3986_v28 = vpop.f32.mrf.mxu0 }
 0x3ed   : > { %v1125_v31 = vpop.xlane.xlu0 %1124 }
 0x3ee   : > { %v1135_v32 = vsub.f32 %v1118_v1, %v1125_v31 }
 0x3f0   : > { %v1139_v33 = vmul.f32 1.442695, %v1135_v32 }
 0x3f2   : > { %4415 = vpow2.f32 %v1139_v33 }
 0x3f5   : > { %v1131_v35 = vpop.xlane.xlu0 %1130  ;;  %v1128_v36 = vpop.xlane.xlu1 %1127 }
 0x3f6   : > { %v1137_v37 = vsub.f32 %v1120_v8, %v1131_v35  ;;  %v1136_v41 = vsub.f32 %v1119_v9, %v1128_v36 }
 0x3f8   : > { %v1143_v42 = vmul.f32 1.442695, %v1137_v37  ;;  %v1141_v44 = vmul.f32 1.442695, %v1136_v41 }
 0x3fa   : > { %4417 = vpow2.f32 %v1143_v42 }
 0x3fb   : > { %4419 = vpow2.f32 %v1141_v44 }
 0x3fd   : > { %v1134_v57 = vpop.xlane.xlu1 %1133 }
 0x3fe   : > { %v1138_v58 = vsub.f32 %v1121_v23, %v1134_v57 }
 0x3ff   : > { %v4416_v45 = vpop.eup %4415 }
 0x400   : > { %v1147_v47 = vsel %vm1122_vm3, %v4416_v45, 0.0  ;;  %v1145_v59 = vmul.f32 1.442695, %v1138_v58 }
 0x401   : > { %1148 = vadd.xlane.f32.xlu0 %v1147_v47 }
 0x402   : > { %4421 = vpow2.f32 %v1145_v59 }
 0x407   : > { %v4418_v48 = vpop.eup %4417 }
 0x408   : > { %v4420_v49 = vpop.eup %4419  ;;  %v1153_v50 = vsel %vm1122_vm3, %v4418_v48, 0.0 }
 0x409   : > { %v1150_v52 = vsel %vm1122_vm3, %v4420_v49, 0.0  ;;  %1154 = vadd.xlane.f32.xlu0 %v1153_v50 }
 0x40a   : > { %1151 = vadd.xlane.f32.xlu1 %v1150_v52 }
 0x40f   : > { %v4422_v60 = vpop.eup %4421 }
 0x410   : > { %v1156_v61 = vsel %vm1122_vm3, %v4422_v60, 0.0 }
 0x41b   : > { %1408 = vrot.lane.b32.xlu1 %v5140_v40, %s4801_s15 }
 0x41f   : > { %1460 = vrot.lane.b32.xlu1 %v5147_v46, %s4801_s15  ;;  %1356 = vrot.lane.b32.xlu0 %v5130_v29, %s4801_s15 }
 0x423   : > { %1360 = vrot.lane.b32.xlu0 %v5204_v53, %s4801_s15 }
 0x427   : > { %1464 = vrot.lane.b32.xlu0 %v5210_v55, %s4801_s15 }
 0x443   : > { %1157 = vadd.xlane.f32.xlu1 %v1156_v61 }
 0x454   : > { %1512 = vrot.lane.b32.xlu1 %v5155_v54, %s4801_s15 }
 0x458   : > { %1412 = vrot.lane.b32.xlu1 %v5219_v25, %s4801_s15 }
 0x45c   : > { %1516 = vrot.lane.b32.xlu1 %v5225_v43, %s4801_s15 }
 0x48a   : > { %v1149_v63 = vpop.xlane.xlu0 %1148 }
 0x48b   : > { %4423 = vrcp.f32 %v1149_v63 }
 0x492   : > { %v1155_v0 = vpop.xlane.xlu0 %1154 }
 0x493   : > { %v1152_v1 = vpop.xlane.xlu1 %1151  ;;  %4425 = vrcp.f32 %v1155_v0 }
 0x494   : > { %4427 = vrcp.f32 %v1152_v1 }
 0x496   : > { %v1357_v5 = vpop.permute.xlu0 %1356 }
 0x497   : > { %v1409_v8 = vpop.permute.xlu1 %1408  ;;  %v1358_v10 = vrot.slane %v1357_v5, 4 }
 0x498   : > { %v4424_v2 = vpop.eup %4423  ;;  %v1410_v27 = vrot.slane %v1409_v8, 4 }
 0x499   : > { %v1163_v3 = vmul.f32 %v4424_v2, %v4416_v45  ;;  %v1366_v18 = vsel %vm930_vm1, %v1358_v10, 0 }
 0x49a   : > { %v1361_v21 = vpop.permute.xlu0 %1360  ;;  %v1418_v32 = vsel %vm930_vm1, %v1410_v27, 0 }
 0x49b   : > { %v1167_v4 = vpack.c.bf16 %v1163_v3, %v1163_v3  ;;  %v1461_v20 = vpop.permute.xlu1 %1460 }
 0x49c   : > { %v1462_v38 = vrot.slane %v1461_v20, 4 }
 0x49d   : > { %3990 = vmatmul.mubr.msk.bf16.vlgmr.msra.gmra.mxu1 %vm1122_vm3, %v1167_v4 }
 0x49e   : > { %4000 = vmatpush3.bf16.msra.mxu1 %v1268_v51  ;;  %4001 = vmatprep.mubr.msk.bf16.mxu1 %vm4800_vm0, %v4799_v14  ;;  %v1470_v22 = vsel %vm930_vm1, %v1462_v38, 0  ;;  %v1465_v23 = vpop.permute.xlu0 %1464 }
 0x49f   : > { %4011 = vmatprep.subr.bf16.mxu1 %v4799_v14 }
 0x4a0   : > { %v4426_v6 = vpop.eup %4425 }
 0x4a1   : > { %v4428_v7 = vpop.eup %4427  ;;  %v1165_v9 = vmul.f32 %v4426_v6, %v4418_v48 }
 0x4a2   : > { %v1164_v12 = vmul.f32 %v4428_v7, %v4420_v49 }
 0x4a3   : > { %v1169_v13 = vpack.c.bf16 %v1165_v9, %v1165_v9 }
 0x4a4   : > { %v1168_v11 = vpack.c.bf16 %v1164_v12, %v1164_v12 }
 0x4a5   : > { %4002 = vmatmul.mubr.msk.bf16.vlgmr.msra.gmra.mxu1 %vm1122_vm3, %v1169_v13 }
 0x4a6   : > { %3996 = vmatmul.mubr.msk.bf16.vlgmr.msra.gmra.mxu0 %vm1122_vm3, %v1168_v11  ;;  %4012 = vmatpush3.bf16.xpose.msra.mxu1 %v1366_v18 }
 0x4a7   : > { %4006 = vmatpush3.bf16.msra.mxu0 %v1314_v19  ;;  %4013 = vmatprep.mubr.msk.bf16.mxu1 %vm4800_vm0, %v4799_v14 }
 0x4a8   : > { %4023 = vmatprep.subr.bf16.mxu1 %v4799_v14  ;;  %4007 = vmatprep.mubr.msk.bf16.mxu0 %vm4800_vm0, %v4799_v14 }
 0x4a9   : > { %4017 = vmatprep.subr.bf16.mxu0 %v4799_v14 }
 0x4ad   : > { %4014 = vmatmul.mubr.msk.bf16.vlgmr.msra.gmra.mxu1 %vm930_vm1, %v1361_v21 }
 0x4ae   : > { %4024 = vmatpush3.bf16.xpose.msra.mxu1 %v1470_v22  ;;  %4025 = vmatprep.mubr.msk.bf16.mxu1 %vm4800_vm0, %v4799_v14 }
 0x4af   : > { %4035 = vmatprep.subr.bf16.mxu1 %v4799_v14 }
 0x4b5   : > { %4026 = vmatmul.mubr.msk.bf16.vlgmr.msra.gmra.mxu1 %vm930_vm1, %v1465_v23 }
 0x4b6   : > { %4037 = vmatprep.mubr.msk.bf16.mxu1 %vm4800_vm0, %v4799_v14 }
 0x4cc   : > { %v1158_v24 = vpop.xlane.xlu1 %1157 }
 0x4cd   : > { %4429 = vrcp.f32 %v1158_v24 }
 0x4d0   : > { %v1513_v33 = vpop.permute.xlu1 %1512 }
 0x4d1   : > { %v1514_v35 = vrot.slane %v1513_v33, 4 }
 0x4d3   : > { %v1522_v37 = vsel %vm930_vm1, %v1514_v35, 0 }
 0x4d4   : > { %v1413_v36 = vpop.permute.xlu1 %1412 }
 0x4d8   : > { %v1517_v41 = vpop.permute.xlu1 %1516 }
 0x4da   : > { %v4430_v26 = vpop.eup %4429 }
 0x4db   : > { %v1166_v28 = vmul.f32 %v4430_v26, %v4422_v60 }
 0x4dd   : > { %v1170_v31 = vpack.c.bf16 %v1166_v28, %v1166_v28 }
 0x4df   : > { %4008 = vmatmul.mubr.msk.bf16.vlgmr.msra.gmra.mxu0 %vm1122_vm3, %v1170_v31 }
 0x4e0   : > { %4018 = vmatpush3.bf16.xpose.msra.mxu0 %v1418_v32  ;;  %4019 = vmatprep.mubr.msk.bf16.mxu0 %vm4800_vm0, %v4799_v14 }
 0x4e1   : > { %4029 = vmatprep.subr.bf16.mxu0 %v4799_v14 }
 0x4e7   : > { %4020 = vmatmul.mubr.msk.bf16.vlgmr.msra.gmra.mxu0 %vm930_vm1, %v1413_v36 }
 0x4e8   : > { %4030 = vmatpush3.bf16.xpose.msra.mxu0 %v1522_v37  ;;  %4031 = vmatprep.mubr.msk.bf16.mxu0 %vm4800_vm0, %v4799_v14 }
 0x4e9   : > { %4041 = vmatprep.subr.bf16.mxu0 %v4799_v14 }
 0x4ef   : > { %4032 = vmatmul.mubr.msk.bf16.vlgmr.msra.gmra.mxu0 %vm930_vm1, %v1517_v41 }
 0x4f0   : > { %4043 = vmatprep.mubr.msk.bf16.mxu0 %vm4800_vm0, %v4799_v14 }
 0x55d   : > { %v5275_v42 = vpop.f32.mrf.mxu1 }
 0x55f   : > { %v3991_v44 = vpop.f32.mrf.mxu1 }
 0x561   : > { %v1215_v45 = vpop.f32.mrf.mxu1 }
 0x563   : > { %v3992_v47 = vpop.f32.mrf.mxu1 }
 0x565   : > { %v5279_v49 = vpop.f32.mrf.mxu1 }
 0x566   : > { %v5277_v48 = vpop.f32.mrf.mxu0 }
 0x567   : > { %v4003_v52 = vpop.f32.mrf.mxu1 }
 0x568   : > { %v3997_v50 = vpop.f32.mrf.mxu0 }
 0x569   : > { %v1307_v58 = vpop.f32.mrf.mxu1 }
 0x56a   : > { %v1261_v57 = vpop.f32.mrf.mxu0 }
 0x56b   : > { %v4004_v60 = vpop.f32.mrf.mxu1 }
 0x56c   : > { %v3998_v59 = vpop.f32.mrf.mxu0 }
 0x56d   : > { %v1402_v61 = vpop.f32.mrf.mxu1 }
 0x56e   : > { %v1564_v63 = vmul.f32 0.17677669, %v1402_v61 }
 0x56f   : > { %v4015_v0 = vpop.f32.mrf.mxu1 }
 0x570   : > { %v1568_v1 = vsel %vm1122_vm3, %v1564_v63, -inf }
 0x571   : > { %1569 = vmax.xlane.f32.xlu0 %v1568_v1  ;;  %v1405_v2 = vpop.f32.mrf.mxu1 }
 0x573   : > { %v4016_v3 = vpop.f32.mrf.mxu1 }
 0x575   : > { %v1506_v4 = vpop.f32.mrf.mxu1 }
 0x576   : > { %v1566_v51 = vmul.f32 0.17677669, %v1506_v4 }
 0x577   : > { %v4027_v5 = vpop.f32.mrf.mxu1 }
 0x578   : > { %v1574_v6 = vsel %vm1122_vm3, %v1566_v51, -inf }
 0x579   : > { %1575 = vmax.xlane.f32.xlu0 %v1574_v6  ;;  %v1509_v7 = vpop.f32.mrf.mxu1 }
 0x57b   : > { %v4028_v8 = vpop.f32.mrf.mxu1 }
 0x59f   : > { %v5283_v9 = vpop.f32.mrf.mxu0 }
 0x5a1   : > { %v4009_v10 = vpop.f32.mrf.mxu0 }
 0x5a3   : > { %v1353_v12 = vpop.f32.mrf.mxu0 }
 0x5a5   : > { %v4010_v13 = vpop.f32.mrf.mxu0 }
 0x5a7   : > { %v1454_v11 = vpop.f32.mrf.mxu0 }
 0x5a8   : > { %v1565_v18 = vmul.f32 0.17677669, %v1454_v11 }
 0x5a9   : > { %v4021_v19 = vpop.f32.mrf.mxu0 }
 0x5aa   : > { %v1571_v20 = vsel %vm1122_vm3, %v1565_v18, -inf }
 0x5ab   : > { %1572 = vmax.xlane.f32.xlu1 %v1571_v20  ;;  %v1457_v38 = vpop.f32.mrf.mxu0 }
 0x5ad   : > { %v4022_v21 = vpop.f32.mrf.mxu0 }
 0x5af   : > { %v1558_v22 = vpop.f32.mrf.mxu0 }
 0x5b0   : > { %v1567_v23 = vmul.f32 0.17677669, %v1558_v22 }
 0x5b1   : > { %v4033_v24 = vpop.f32.mrf.mxu0 }
 0x5b2   : > { %v1577_v26 = vsel %vm1122_vm3, %v1567_v23, -inf }
 0x5b3   : > { %v1561_v27 = vpop.f32.mrf.mxu0  ;;  %1578 = vmax.xlane.f32.xlu0 %v1577_v26 }
 0x5b5   : > { %v4034_v28 = vpop.f32.mrf.mxu0 }
 0x5bc   : > { %1664 = vrot.lane.b32.xlu1 %v5180_v62, %s4801_s15 }
 0x5c0   : > { %1712 = vrot.lane.b32.xlu1 %v5231_v34, %s4801_s15 }
 0x5c4   : > { %1760 = vrot.lane.b32.xlu1 %v5241_v30, %s4801_s15 }
 0x5fa   : > { %v1570_v31 = vpop.xlane.xlu0 %1569 }
 0x5fb   : > { %v1580_v32 = vsub.f32 %v1564_v63, %v1570_v31 }
 0x5fd   : > { %v1584_v33 = vmul.f32 1.442695, %v1580_v32 }
 0x5ff   : > { %4431 = vpow2.f32 %v1584_v33 }
 0x602   : > { %v1576_v37 = vpop.xlane.xlu0 %1575 }
 0x603   : > { %v1582_v41 = vsub.f32 %v1566_v51, %v1576_v37 }
 0x605   : > { %v1588_v44 = vmul.f32 1.442695, %v1582_v41 }
 0x607   : > { %4433 = vpow2.f32 %v1588_v44 }
 0x60c   : > { %v4432_v35 = vpop.eup %4431 }
 0x60d   : > { %v1592_v36 = vsel %vm1122_vm3, %v4432_v35, 0.0 }
 0x60e   : > { %1593 = vadd.xlane.f32.xlu0 %v1592_v36 }
 0x614   : > { %v4434_v58 = vpop.eup %4433 }
 0x615   : > { %v1598_v59 = vsel %vm1122_vm3, %v4434_v58, 0.0 }
 0x624   : > { %1616 = vrot.lane.b32.xlu0 %v5164_v56, %s4801_s15 }
 0x634   : > { %v1573_v45 = vpop.xlane.xlu1 %1572 }
 0x635   : > { %v1581_v47 = vsub.f32 %v1565_v18, %v1573_v45 }
 0x637   : > { %v1586_v50 = vmul.f32 1.442695, %v1581_v47 }
 0x638   : > { %v1665_v52 = vpop.permute.xlu1 %1664 }
 0x639   : > { %4435 = vpow2.f32 %v1586_v50  ;;  %v1670_v57 = vsel %vm1174_vm2, %v1665_v52, 0 }
 0x63a   : > { %4042 = vmatpush3.bf16.msra.mxu0 %v1670_v57 }
 0x63b   : > { %4053 = vmatprep.subr.bf16.mxu0 %v4799_v14 }
 0x63c   : > { %v1579_v63 = vpop.xlane.xlu0 %1578  ;;  %v1713_v8 = vpop.permute.xlu1 %1712 }
 0x63d   : > { %v1583_v0 = vsub.f32 %v1567_v23, %v1579_v63  ;;  %v1718_v12 = vsel %vm1174_vm2, %v1713_v8, 0 }
 0x63f   : > { %v1590_v1 = vmul.f32 1.442695, %v1583_v0 }
 0x640   : > { %v1761_v13 = vpop.permute.xlu1 %1760 }
 0x641   : > { %4437 = vpow2.f32 %v1590_v1  ;;  %v1766_v31 = vsel %vm1174_vm2, %v1761_v13, 0 }
 0x643   : > { %1599 = vadd.xlane.f32.xlu0 %v1598_v59 }
 0x646   : > { %v4436_v60 = vpop.eup %4435 }
 0x647   : > { %v1595_v61 = vsel %vm1122_vm3, %v4436_v60, 0.0 }
 0x648   : > { %1596 = vadd.xlane.f32.xlu1 %v1595_v61 }
 0x64e   : > { %v4438_v2 = vpop.eup %4437 }
 0x64f   : > { %v1601_v3 = vsel %vm1122_vm3, %v4438_v2, 0.0 }
 0x659   : > { %1859 = vrot.lane.b32.xlu1 %v5140_v40, %s4802_s16  ;;  %1808 = vrot.lane.b32.xlu0 %v5130_v29, %s4802_s16 }
 0x65d   : > { %1910 = vrot.lane.b32.xlu0 %v5147_v46, %s4802_s16 }
 0x661   : > { %1811 = vrot.lane.b32.xlu0 %v5204_v53, %s4802_s16 }
 0x665   : > { %1913 = vrot.lane.b32.xlu0 %v5210_v55, %s4802_s16 }
 0x67d   : > { %1602 = vadd.xlane.f32.xlu1 %v1601_v3 }
 0x68e   : > { %1961 = vrot.lane.b32.xlu1 %v5155_v54, %s4802_s16 }
 0x692   : > { %1862 = vrot.lane.b32.xlu1 %v5219_v25, %s4802_s16 }
 0x696   : > { %1964 = vrot.lane.b32.xlu1 %v5225_v43, %s4802_s16 }
 0x697   : > { %v1594_v4 = vpop.xlane.xlu0 %1593 }
 0x698   : > { %4439 = vrcp.f32 %v1594_v4 }
 0x69b   : > { %v1617_v51 = vpop.permute.xlu0 %1616 }
 0x69c   : > { %v1622_v5 = vsel %vm1174_vm2, %v1617_v51, 0 }
 0x69d   : > { %4036 = vmatpush3.bf16.msra.mxu1 %v1622_v5 }
 0x69e   : > { %4047 = vmatprep.subr.bf16.mxu1 %v4799_v14 }
 0x6a5   : > { %v4440_v6 = vpop.eup %4439 }
 0x6a6   : > { %v1608_v7 = vmul.f32 %v4440_v6, %v4432_v35 }
 0x6a8   : > { %v1612_v10 = vpack.c.bf16 %v1608_v7, %v1608_v7 }
 0x6aa   : > { %4038 = vmatmul.mubr.msk.bf16.vlgmr.msra.gmra.mxu1 %vm1122_vm3, %v1612_v10 }
 0x6ab   : > { %4048 = vmatpush3.bf16.msra.mxu1 %v1718_v12  ;;  %4049 = vmatprep.mubr.msk.bf16.mxu1 %vm4800_vm0, %v4799_v14 }
 0x6ac   : > { %4059 = vmatprep.subr.bf16.mxu1 %v4799_v14 }
 0x6cc   : > { %v1600_v11 = vpop.xlane.xlu0 %1599 }
 0x6cd   : > { %4441 = vrcp.f32 %v1600_v11 }
 0x6d0   : > { %v1809_v19 = vpop.permute.xlu0 %1808 }
 0x6d1   : > { %v1597_v18 = vpop.xlane.xlu1 %1596  ;;  %v1810_v38 = vrot.slane %v1809_v19, 4 }
 0x6d2   : > { %4443 = vrcp.f32 %v1597_v18 }
 0x6d3   : > { %v1817_v24 = vsel %vm930_vm1, %v1810_v38, 0 }
 0x6d4   : > { %v1911_v27 = vpop.permute.xlu0 %1910 }
 0x6d5   : > { %v1912_v32 = vrot.slane %v1911_v27, 4  ;;  %v1860_v37 = vpop.permute.xlu1 %1859 }
 0x6d6   : > { %v1861_v45 = vrot.slane %v1860_v37, 4 }
 0x6d7   : > { %v1919_v35 = vsel %vm930_vm1, %v1912_v32, 0 }
 0x6d8   : > { %v1812_v33 = vpop.permute.xlu0 %1811  ;;  %v1868_v52 = vsel %vm930_vm1, %v1861_v45, 0 }
 0x6da   : > { %v4442_v20 = vpop.eup %4441 }
 0x6db   : > { %v1610_v21 = vmul.f32 %v4442_v20, %v4434_v58 }
 0x6dc   : > { %v1914_v36 = vpop.permute.xlu0 %1913 }
 0x6dd   : > { %v1614_v22 = vpack.c.bf16 %v1610_v21, %v1610_v21 }
 0x6df   : > { %v4444_v23 = vpop.eup %4443  ;;  %4050 = vmatmul.mubr.msk.bf16.vlgmr.msra.gmra.mxu1 %vm1122_vm3, %v1614_v22 }
 0x6e0   : > { %v1609_v26 = vmul.f32 %v4444_v23, %v4436_v60  ;;  %4060 = vmatpush3.bf16.xpose.msra.mxu1 %v1817_v24  ;;  %4061 = vmatprep.mubr.msk.bf16.mxu1 %vm4800_vm0, %v4799_v14 }
 0x6e1   : > { %4071 = vmatprep.subr.bf16.mxu1 %v4799_v14 }
 0x6e2   : > { %v1613_v28 = vpack.c.bf16 %v1609_v26, %v1609_v26 }
 0x6e4   : > { %4044 = vmatmul.mubr.msk.bf16.vlgmr.msra.gmra.mxu0 %vm1122_vm3, %v1613_v28 }
 0x6e5   : > { %4054 = vmatpush3.bf16.msra.mxu0 %v1766_v31  ;;  %4055 = vmatprep.mubr.msk.bf16.mxu0 %vm4800_vm0, %v4799_v14 }
 0x6e6   : > { %4065 = vmatprep.subr.bf16.mxu0 %v4799_v14 }
 0x6e7   : > { %4062 = vmatmul.mubr.msk.bf16.vlgmr.msra.gmra.mxu1 %vm930_vm1, %v1812_v33 }
 0x6e8   : > { %4072 = vmatpush3.bf16.xpose.msra.mxu1 %v1919_v35  ;;  %4073 = vmatprep.mubr.msk.bf16.mxu1 %vm4800_vm0, %v4799_v14 }
 0x6e9   : > { %4083 = vmatprep.subr.bf16.mxu1 %v4799_v14 }
 0x6ef   : > { %4074 = vmatmul.mubr.msk.bf16.vlgmr.msra.gmra.mxu1 %vm930_vm1, %v1914_v36 }
 0x6f0   : > { %4085 = vmatprep.mubr.msk.bf16.mxu1 %vm4800_vm0, %v4799_v14 }
 0x706   : > { %v1603_v41 = vpop.xlane.xlu1 %1602 }
 0x707   : > { %4445 = vrcp.f32 %v1603_v41 }
 0x70a   : > { %v1962_v57 = vpop.permute.xlu1 %1961 }
 0x70b   : > { %v1963_v58 = vrot.slane %v1962_v57, 4 }
 0x70d   : > { %v1970_v60 = vsel %vm930_vm1, %v1963_v58, 0 }
 0x70e   : > { %v1863_v59 = vpop.permute.xlu1 %1862 }
 0x712   : > { %v1965_v61 = vpop.permute.xlu1 %1964 }
 0x714   : > { %v4446_v44 = vpop.eup %4445 }
 0x715   : > { %v1611_v47 = vmul.f32 %v4446_v44, %v4438_v2 }
 0x717   : > { %v1615_v50 = vpack.c.bf16 %v1611_v47, %v1611_v47 }
 0x719   : > { %4056 = vmatmul.mubr.msk.bf16.vlgmr.msra.gmra.mxu0 %vm1122_vm3, %v1615_v50 }
 0x71a   : > { %4066 = vmatpush3.bf16.xpose.msra.mxu0 %v1868_v52  ;;  %4067 = vmatprep.mubr.msk.bf16.mxu0 %vm4800_vm0, %v4799_v14 }
 0x71b   : > { %4077 = vmatprep.subr.bf16.mxu0 %v4799_v14 }
 0x721   : > { %4068 = vmatmul.mubr.msk.bf16.vlgmr.msra.gmra.mxu0 %vm930_vm1, %v1863_v59 }
 0x722   : > { %4078 = vmatpush3.bf16.xpose.msra.mxu0 %v1970_v60  ;;  %4079 = vmatprep.mubr.msk.bf16.mxu0 %vm4800_vm0, %v4799_v14 }
 0x723   : > { %4089 = vmatprep.subr.bf16.mxu0 %v4799_v14 }
 0x729   : > { %4080 = vmatmul.mubr.msk.bf16.vlgmr.msra.gmra.mxu0 %vm930_vm1, %v1965_v61 }
 0x72a   : > { %4091 = vmatprep.mubr.msk.bf16.mxu0 %vm4800_vm0, %v4799_v14 }
 0x76a   : > { %v5355_v63 = vpop.f32.mrf.mxu1 }
 0x76c   : > { %v4039_v0 = vpop.f32.mrf.mxu1 }
 0x76e   : > { %v1661_v1 = vpop.f32.mrf.mxu1 }
 0x770   : > { %v4040_v2 = vpop.f32.mrf.mxu1 }
 0x79f   : > { %v5357_v3 = vpop.f32.mrf.mxu1 }
 0x7a1   : > { %v4051_v4 = vpop.f32.mrf.mxu1 }
 0x7a3   : > { %v1757_v5 = vpop.f32.mrf.mxu1 }
 0x7a4   : > { %v5359_v51 = vpop.f32.mrf.mxu0 }
 0x7a5   : > { %v4297_v6 = vpack.i.bf16 %v5359_v51, %v5355_v63  ;;  %v4052_v8 = vpop.f32.mrf.mxu1 }
 0x7a6   : > { %v4045_v7 = vpop.f32.mrf.mxu0 }
 0x7a7   : > { %v1853_v12 = vpop.f32.mrf.mxu1 }
 0x7a8   : > { %v1709_v10 = vpop.f32.mrf.mxu0  ;;  %v2012_v13 = vmul.f32 0.17677669, %v1853_v12 }
 0x7a9   : > { %v4063_v18 = vpop.f32.mrf.mxu1 }
 0x7aa   : > { %v4046_v11 = vpop.f32.mrf.mxu0  ;;  %v2016_v19 = vsel %vm1122_vm3, %v2012_v13, -inf }
 0x7ab   : > { %2017 = vmax.xlane.f32.xlu0 %v2016_v19  ;;  %v1856_v20 = vpop.f32.mrf.mxu1 }
 0x7ad   : > { %v4064_v38 = vpop.f32.mrf.mxu1 }
 0x7af   : > { %v1955_v21 = vpop.f32.mrf.mxu1 }
 0x7b0   : > { %v2014_v22 = vmul.f32 0.17677669, %v1955_v21 }
 0x7b1   : > { %v4075_v23 = vpop.f32.mrf.mxu1 }
 0x7b2   : > { %v2022_v24 = vsel %vm1122_vm3, %v2014_v22, -inf }
 0x7b3   : > { %2023 = vmax.xlane.f32.xlu0 %v2022_v24  ;;  %v1958_v26 = vpop.f32.mrf.mxu1 }
 0x7b5   : > { %v4076_v27 = vpop.f32.mrf.mxu1 }
 0x7d9   : > { %v5365_v28 = vpop.f32.mrf.mxu0 }
 0x7da   : > { %v4302_v31 = vpack.i.bf16 %v5365_v28, %v5357_v3 }
 0x7db   : > { %v4057_v32 = vpop.f32.mrf.mxu0 }
 0x7dd   : > { %v1805_v33 = vpop.f32.mrf.mxu0 }
 0x7df   : > { %v4058_v35 = vpop.f32.mrf.mxu0 }
 0x7e1   : > { %v1904_v36 = vpop.f32.mrf.mxu0 }
 0x7e2   : > { %v2013_v37 = vmul.f32 0.17677669, %v1904_v36 }
 0x7e3   : > { %v4069_v41 = vpop.f32.mrf.mxu0 }
 0x7e4   : > { %v2019_v44 = vsel %vm1122_vm3, %v2013_v37, -inf }
 0x7e5   : > { %2020 = vmax.xlane.f32.xlu1 %v2019_v44  ;;  %v1907_v45 = vpop.f32.mrf.mxu0 }
 0x7e7   : > { %v4070_v47 = vpop.f32.mrf.mxu0 }
 0x7e9   : > { %v2006_v50 = vpop.f32.mrf.mxu0 }
 0x7ea   : > { %v2015_v52 = vmul.f32 0.17677669, %v2006_v50 }
 0x7eb   : > { %v4081_v57 = vpop.f32.mrf.mxu0 }
 0x7ec   : > { %v2025_v58 = vsel %vm1122_vm3, %v2015_v52, -inf }
 0x7ed   : > { %v2009_v59 = vpop.f32.mrf.mxu0  ;;  %2026 = vmax.xlane.f32.xlu0 %v2025_v58 }
 0x7ef   : > { %v4082_v60 = vpop.f32.mrf.mxu0 }
 0x7f6   : > { %2112 = vrot.lane.b32.xlu1 %v5180_v62, %s4802_s16 }
 0x7fa   : > { %2160 = vrot.lane.b32.xlu1 %v5231_v34, %s4802_s16 }
 0x7fe   : > { %2208 = vrot.lane.b32.xlu1 %v5241_v30, %s4802_s16 }
 0x834   : > { %v2018_v61 = vpop.xlane.xlu0 %2017 }
 0x835   : > { %v2028_v0 = vsub.f32 %v2012_v13, %v2018_v61 }
 0x837   : > { %v2032_v1 = vmul.f32 1.442695, %v2028_v0 }
 0x839   : > { %4447 = vpow2.f32 %v2032_v1 }
 0x83c   : > { %v2024_v5 = vpop.xlane.xlu0 %2023 }
 0x83d   : > { %v2030_v7 = vsub.f32 %v2014_v22, %v2024_v5 }
 0x83f   : > { %v2036_v8 = vmul.f32 1.442695, %v2030_v7 }
 0x841   : > { %4449 = vpow2.f32 %v2036_v8 }
 0x846   : > { %v4448_v2 = vpop.eup %4447 }
 0x847   : > { %v2040_v4 = vsel %vm1122_vm3, %v4448_v2, 0.0 }
 0x848   : > { %2041 = vadd.xlane.f32.xlu0 %v2040_v4 }
 0x84e   : > { %v4450_v19 = vpop.eup %4449 }
 0x84f   : > { %v2046_v20 = vsel %vm1122_vm3, %v4450_v19, 0.0 }
 0x85e   : > { %2064 = vrot.lane.b32.xlu0 %v5164_v56, %s4802_s16 }
 0x86e   : > { %v2021_v10 = vpop.xlane.xlu1 %2020 }
 0x86f   : > { %v2029_v12 = vsub.f32 %v2013_v37, %v2021_v10 }
 0x871   : > { %v2034_v11 = vmul.f32 1.442695, %v2029_v12 }
 0x872   : > { %v2113_v18 = vpop.permute.xlu1 %2112 }
 0x873   : > { %4451 = vpow2.f32 %v2034_v11  ;;  %v2118_v13 = vsel %vm1174_vm2, %v2113_v18, 0 }
 0x874   : > { %4090 = vmatpush3.bf16.msra.mxu0 %v2118_v13 }
 0x875   : > { %4101 = vmatprep.subr.bf16.mxu0 %v4799_v14 }
 0x876   : > { %v2027_v22 = vpop.xlane.xlu0 %2026  ;;  %v2161_v32 = vpop.permute.xlu1 %2160 }
 0x877   : > { %v2031_v23 = vsub.f32 %v2015_v52, %v2027_v22 }
 0x879   : > { %v2038_v24 = vmul.f32 1.442695, %v2031_v23 }
 0x87b   : > { %4453 = vpow2.f32 %v2038_v24 }
 0x87d   : > { %2047 = vadd.xlane.f32.xlu0 %v2046_v20 }
 0x880   : > { %v4452_v38 = vpop.eup %4451 }
 0x881   : > { %v2043_v21 = vsel %vm1122_vm3, %v4452_v38, 0.0 }
 0x882   : > { %2044 = vadd.xlane.f32.xlu1 %v2043_v21 }
 0x888   : > { %v4454_v26 = vpop.eup %4453 }
 0x889   : > { %v2049_v27 = vsel %vm1122_vm3, %v4454_v26, 0.0 }
 0x893   : > { %2307 = vrot.lane.b32.xlu1 %v5140_v40, %s4803_s1  ;;  %2256 = vrot.lane.b32.xlu0 %v5130_v29, %s4803_s1 }
 0x897   : > { %2358 = vrot.lane.b32.xlu0 %v5147_v46, %s4803_s1 }
 0x89b   : > { %2259 = vrot.lane.b32.xlu0 %v5204_v53, %s4803_s1 }
 0x89f   : > { %2361 = vrot.lane.b32.xlu0 %v5210_v55, %s4803_s1 }
 0x8b7   : > { %2050 = vadd.xlane.f32.xlu1 %v2049_v27 }
 0x8c8   : > { %2409 = vrot.lane.b32.xlu1 %v5155_v54, %s4803_s1  ;;  %v2166_v54 = vsel %vm1174_vm2, %v2161_v32, 0 }
 0x8cc   : > { %2310 = vrot.lane.b32.xlu1 %v5219_v25, %s4803_s1  ;;  %v2209_v25 = vpop.permute.xlu1 %2208 }
 0x8cd   : > { %v2214_v59 = vsel %vm1174_vm2, %v2209_v25, 0 }
 0x8d0   : > { %2412 = vrot.lane.b32.xlu1 %v5225_v43, %s4803_s1 }
 0x8d1   : > { %v2042_v29 = vpop.xlane.xlu0 %2041 }
 0x8d2   : > { %4455 = vrcp.f32 %v2042_v29 }
 0x8d5   : > { %v2065_v40 = vpop.permute.xlu0 %2064 }
 0x8d6   : > { %v2070_v46 = vsel %vm1174_vm2, %v2065_v40, 0 }
 0x8d7   : > { %4084 = vmatpush3.bf16.msra.mxu1 %v2070_v46 }
 0x8d8   : > { %4095 = vmatprep.subr.bf16.mxu1 %v4799_v14 }
 0x8df   : > { %v4456_v53 = vpop.eup %4455 }
 0x8e0   : > { %v2056_v55 = vmul.f32 %v4456_v53, %v4448_v2 }
 0x8e2   : > { %v2060_v33 = vpack.c.bf16 %v2056_v55, %v2056_v55 }
 0x8e4   : > { %4086 = vmatmul.mubr.msk.bf16.vlgmr.msra.gmra.mxu1 %vm1122_vm3, %v2060_v33 }
 0x8e5   : > { %4096 = vmatpush3.bf16.msra.mxu1 %v2166_v54  ;;  %4097 = vmatprep.mubr.msk.bf16.mxu1 %vm4800_vm0, %v4799_v14 }
 0x8e6   : > { %4107 = vmatprep.subr.bf16.mxu1 %v4799_v14 }
 0x906   : > { %v2048_v43 = vpop.xlane.xlu0 %2047 }
 0x907   : > { %4457 = vrcp.f32 %v2048_v43 }
 0x90a   : > { %v2257_v36 = vpop.permute.xlu0 %2256 }
 0x90b   : > { %v2045_v35 = vpop.xlane.xlu1 %2044  ;;  %v2258_v41 = vrot.slane %v2257_v36, 4 }
 0x90c   : > { %4459 = vrcp.f32 %v2045_v35 }
 0x90d   : > { %v2265_v50 = vsel %vm930_vm1, %v2258_v41, 0 }
 0x90e   : > { %v2359_v57 = vpop.permute.xlu0 %2358 }
 0x90f   : > { %v2360_v60 = vrot.slane %v2359_v57, 4  ;;  %v2308_v2 = vpop.permute.xlu1 %2307 }
 0x910   : > { %v2309_v7 = vrot.slane %v2308_v2, 4 }
 0x911   : > { %v2367_v0 = vsel %vm930_vm1, %v2360_v60, 0 }
 0x912   : > { %v2260_v61 = vpop.permute.xlu0 %2259  ;;  %v2316_v12 = vsel %vm930_vm1, %v2309_v7, 0 }
 0x914   : > { %v4458_v37 = vpop.eup %4457 }
 0x915   : > { %v2058_v44 = vmul.f32 %v4458_v37, %v4450_v19 }
 0x916   : > { %v2362_v1 = vpop.permute.xlu0 %2361 }
 0x917   : > { %v2062_v45 = vpack.c.bf16 %v2058_v44, %v2058_v44 }
 0x919   : > { %v4460_v47 = vpop.eup %4459  ;;  %4098 = vmatmul.mubr.msk.bf16.vlgmr.msra.gmra.mxu1 %vm1122_vm3, %v2062_v45 }
 0x91a   : > { %v2057_v52 = vmul.f32 %v4460_v47, %v4452_v38  ;;  %4108 = vmatpush3.bf16.xpose.msra.mxu1 %v2265_v50  ;;  %4109 = vmatprep.mubr.msk.bf16.mxu1 %vm4800_vm0, %v4799_v14 }
 0x91b   : > { %4119 = vmatprep.subr.bf16.mxu1 %v4799_v14 }
 0x91c   : > { %v2061_v58 = vpack.c.bf16 %v2057_v52, %v2057_v52 }
 0x91e   : > { %4092 = vmatmul.mubr.msk.bf16.vlgmr.msra.gmra.mxu0 %vm1122_vm3, %v2061_v58 }
 0x91f   : > { %4102 = vmatpush3.bf16.msra.mxu0 %v2214_v59  ;;  %4103 = vmatprep.mubr.msk.bf16.mxu0 %vm4800_vm0, %v4799_v14 }
 0x920   : > { %4113 = vmatprep.subr.bf16.mxu0 %v4799_v14 }
 0x921   : > { %4110 = vmatmul.mubr.msk.bf16.vlgmr.msra.gmra.mxu1 %vm930_vm1, %v2260_v61 }
 0x922   : > { %4120 = vmatpush3.bf16.xpose.msra.mxu1 %v2367_v0  ;;  %4121 = vmatprep.mubr.msk.bf16.mxu1 %vm4800_vm0, %v4799_v14 }
 0x923   : > { %4131 = vmatprep.subr.bf16.mxu1 %v4799_v14 }
 0x929   : > { %4122 = vmatmul.mubr.msk.bf16.vlgmr.msra.gmra.mxu1 %vm930_vm1, %v2362_v1 }
 0x92a   : > { %4133 = vmatprep.mubr.msk.bf16.mxu1 %vm4800_vm0, %v4799_v14 }
 0x940   : > { %v2051_v4 = vpop.xlane.xlu1 %2050 }
 0x941   : > { %4461 = vrcp.f32 %v2051_v4 }
 0x944   : > { %v2410_v11 = vpop.permute.xlu1 %2409 }
 0x945   : > { %v2411_v18 = vrot.slane %v2410_v11, 4 }
 0x947   : > { %v2418_v19 = vsel %vm930_vm1, %v2411_v18, 0 }
 0x948   : > { %v2311_v13 = vpop.permute.xlu1 %2310 }
 0x94c   : > { %v2413_v20 = vpop.permute.xlu1 %2412 }
 0x94e   : > { %v4462_v5 = vpop.eup %4461 }
 0x94f   : > { %v2059_v8 = vmul.f32 %v4462_v5, %v4454_v26 }
 0x951   : > { %v2063_v10 = vpack.c.bf16 %v2059_v8, %v2059_v8 }
 0x953   : > { %4104 = vmatmul.mubr.msk.bf16.vlgmr.msra.gmra.mxu0 %vm1122_vm3, %v2063_v10 }
 0x954   : > { %4114 = vmatpush3.bf16.xpose.msra.mxu0 %v2316_v12  ;;  %4115 = vmatprep.mubr.msk.bf16.mxu0 %vm4800_vm0, %v4799_v14 }
 0x955   : > { %4125 = vmatprep.subr.bf16.mxu0 %v4799_v14 }
 0x95b   : > { %4116 = vmatmul.mubr.msk.bf16.vlgmr.msra.gmra.mxu0 %vm930_vm1, %v2311_v13 }
 0x95c   : > { %4126 = vmatpush3.bf16.xpose.msra.mxu0 %v2418_v19  ;;  %4127 = vmatprep.mubr.msk.bf16.mxu0 %vm4800_vm0, %v4799_v14 }
 0x95d   : > { %4137 = vmatprep.subr.bf16.mxu0 %v4799_v14 }
 0x963   : > { %4128 = vmatmul.mubr.msk.bf16.vlgmr.msra.gmra.mxu0 %vm930_vm1, %v2413_v20 }
 0x964   : > { %4139 = vmatprep.mubr.msk.bf16.mxu0 %vm4800_vm0, %v4799_v14 }
 0x9a4   : > { %v5439_v38 = vpop.f32.mrf.mxu1 }
 0x9a6   : > { %v4087_v21 = vpop.f32.mrf.mxu1 }
 0x9a8   : > { %v2109_v22 = vpop.f32.mrf.mxu1 }
 0x9aa   : > { %v4088_v23 = vpop.f32.mrf.mxu1 }
 0x9d9   : > { %v5441_v24 = vpop.f32.mrf.mxu1 }
 0x9db   : > { %v4099_v26 = vpop.f32.mrf.mxu1 }
 0x9dd   : > { %v2205_v29 = vpop.f32.mrf.mxu1 }
 0x9de   : > { %v2154_v27 = vpop.f32.mrf.mxu0 }
 0x9df   : > { %v4307_v40 = vpack.i.bf16 %v2154_v27, %v5439_v38  ;;  %v4100_v53 = vpop.f32.mrf.mxu1 }
 0x9e0   : > { %v4093_v46 = vpop.f32.mrf.mxu0 }
 0x9e1   : > { %v2301_v32 = vpop.f32.mrf.mxu1 }
 0x9e2   : > { %v2157_v55 = vpop.f32.mrf.mxu0  ;;  %v2460_v33 = vmul.f32 0.17677669, %v2301_v32 }
 0x9e3   : > { %v4111_v25 = vpop.f32.mrf.mxu1 }
 0x9e4   : > { %v4094_v54 = vpop.f32.mrf.mxu0  ;;  %v2464_v43 = vsel %vm1122_vm3, %v2460_v33, -inf }
 0x9e5   : > { %2465 = vmax.xlane.f32.xlu0 %v2464_v43  ;;  %v2304_v35 = vpop.f32.mrf.mxu1 }
 0x9e7   : > { %v4112_v36 = vpop.f32.mrf.mxu1 }
 0x9e9   : > { %v2403_v37 = vpop.f32.mrf.mxu1 }
 0x9ea   : > { %v2462_v41 = vmul.f32 0.17677669, %v2403_v37 }
 0x9eb   : > { %v4123_v44 = vpop.f32.mrf.mxu1 }
 0x9ec   : > { %v2470_v45 = vsel %vm1122_vm3, %v2462_v41, -inf }
 0x9ed   : > { %2471 = vmax.xlane.f32.xlu0 %v2470_v45  ;;  %v2406_v47 = vpop.f32.mrf.mxu1 }
 0x9ef   : > { %v4124_v50 = vpop.f32.mrf.mxu1 }
 0xa13   : > { %v2250_v52 = vpop.f32.mrf.mxu0 }
 0xa14   : > { %v4312_v57 = vpack.i.bf16 %v2250_v52, %v5441_v24 }
 0xa15   : > { %v4105_v58 = vpop.f32.mrf.mxu0 }
 0xa17   : > { %v2253_v59 = vpop.f32.mrf.mxu0 }
 0xa19   : > { %v4106_v60 = vpop.f32.mrf.mxu0 }
 0xa1b   : > { %v2352_v61 = vpop.f32.mrf.mxu0 }
 0xa1c   : > { %v2461_v0 = vmul.f32 0.17677669, %v2352_v61 }
 0xa1d   : > { %v4117_v1 = vpop.f32.mrf.mxu0 }
 0xa1e   : > { %v2467_v2 = vsel %vm1122_vm3, %v2461_v0, -inf }
 0xa1f   : > { %2468 = vmax.xlane.f32.xlu1 %v2467_v2  ;;  %v2355_v4 = vpop.f32.mrf.mxu0 }
 0xa21   : > { %v4118_v5 = vpop.f32.mrf.mxu0 }
 0xa23   : > { %v2454_v7 = vpop.f32.mrf.mxu0 }
 0xa24   : > { %v2463_v8 = vmul.f32 0.17677669, %v2454_v7  ;;  %v4359_v7 = vld [vmem:[#allocation10 + $0x38] sm:$0xff]  }
 0xa25   : > { %v4129_v10 = vpop.f32.mrf.mxu0 }
 0xa26   : > { %v2473_v12 = vsel %vm1122_vm3, %v2463_v8, -inf }
 0xa27   : > { %v2457_v11 = vpop.f32.mrf.mxu0  ;;  %2474 = vmax.xlane.f32.xlu0 %v2473_v12  ;;  %v4361_v12 = vld [vmem:[#allocation10 + $0x28] sm:$0xff]  }
 0xa29   : > { %v4130_v18 = vpop.f32.mrf.mxu0 }
 0xa6e   : > { %v2466_v13 = vpop.xlane.xlu0 %2465 }
 0xa6f   : > { %v2476_v19 = vsub.f32 %v2460_v33, %v2466_v13 }
 0xa71   : > { %v2480_v20 = vmul.f32 1.442695, %v2476_v19 }
 0xa73   : > { %4463 = vpow2.f32 %v2480_v20  ;;  %v4362_v20 = vld [vmem:[#allocation10 + $0x20] sm:$0xff]  }
 0xa76   : > { %v2472_v38 = vpop.xlane.xlu0 %2471 }
 0xa77   : > { %v2478_v21 = vsub.f32 %v2462_v41, %v2472_v38 }
 0xa79   : > { %v2484_v22 = vmul.f32 1.442695, %v2478_v21 }
 0xa7b   : > { %4465 = vpow2.f32 %v2484_v22  ;;  %v4363_v22 = vld [vmem:[#allocation10 + $0x18] sm:$0xff]  }
 0xa80   : > { %v4464_v23 = vpop.eup %4463 }
 0xa81   : > { %v2488_v24 = vsel %vm1122_vm3, %v4464_v23, 0.0 }
 0xa82   : > { %2489 = vadd.xlane.f32.xlu0 %v2488_v24  ;;  %v4365_v24 = vld [vmem:[#allocation10 + $0x8] sm:$0xff]  }
 0xa88   : > { %v4466_v26 = vpop.eup %4465 }
 0xa89   : > { %v2494_v27 = vsel %vm1122_vm3, %v4466_v26, 0.0 }
 0xa8a   : > { %2495 = vadd.xlane.f32.xlu0 %v2494_v27 }
 0xaa0   : > { %2512 = vrot.lane.b32.xlu0 %v5164_v56, %s4803_s1 }
 0xaa4   : > { %4298 = vrot.lane.b32.xlu0 %v4297_v6, %s4803_s1 }
 0xaa8   : > { %v2469_v29 = vpop.xlane.xlu1 %2468  ;;  %4308 = vrot.lane.b32.xlu0 %v4307_v40, %s4802_s16 }
 0xaa9   : > { %v2477_v46 = vsub.f32 %v2461_v0, %v2469_v29 }
 0xaab   : > { %v2482_v53 = vmul.f32 1.442695, %v2477_v46 }
 0xaad   : > { %4467 = vpow2.f32 %v2482_v53 }
 0xab0   : > { %v2475_v56 = vpop.xlane.xlu0 %2474 }
 0xab1   : > { %v2479_v33 = vsub.f32 %v2463_v8, %v2475_v56 }
 0xab3   : > { %v2486_v63 = vmul.f32 1.442695, %v2479_v33 }
 0xab5   : > { %4469 = vpow2.f32 %v2486_v63 }
 0xaba   : > { %v4468_v55 = vpop.eup %4467 }
 0xabb   : > { %v2491_v32 = vsel %vm1122_vm3, %v4468_v55, 0.0 }
 0xabc   : > { %2492 = vadd.xlane.f32.xlu1 %v2491_v32 }
 0xac2   : > { %v4470_v51 = vpop.eup %4469 }
 0xac3   : > { %v2497_v6 = vsel %vm1122_vm3, %v4470_v51, 0.0 }
 0xacd   : > { %2560 = vrot.lane.b32.xlu1 %v5180_v62, %s4803_s1 }
 0xad1   : > { %2608 = vrot.lane.b32.xlu1 %v5231_v34, %s4803_s1 }
 0xaf5   : > { %2498 = vadd.xlane.f32.xlu1 %v2497_v6 }
 0xb06   : > { %2656 = vrot.lane.b32.xlu1 %v5241_v30, %s4803_s1 }
 0xb0a   : > { %4303 = vrot.lane.b32.xlu1 %v4302_v31, %s4803_s1  ;;  %s3830_s1 = sshll.u32 %s4899_s14, 9  ;;  %s4805_s14 = smov [#allocation14]  }
 0xb0b   : > { %v2490_v62 = vpop.xlane.xlu0 %2489  ;;  %s5712_s23 = scalar_lea.hbm %s5769_s13, %s3830_s1  ;;  %s4711_s11 = sshll.u32 %s4805_s14, 4  ;;  %s4712_s11 = int_to_ptr.vmem [resolvable:$false] %s4711_s11 }
 0xb0c   : > { %4471 = vrcp.f32 %v2490_v62  ;;  %s4713_s29 = scalar_lea.vmem %s4712_s11, 1024 }
 0xb0e   : > { %4313 = vrot.lane.b32.xlu1 %v4312_v57, %s4802_s16 }
 0xb13   : > { %v2496_v34 = vpop.xlane.xlu0 %2495 }
 0xb14   : > { %4473 = vrcp.f32 %v2496_v34 }
 0xb17   : > { %v2513_v40 = vpop.permute.xlu0 %2512 }
 0xb18   : > { %v2518_v54 = vsel %vm1174_vm2, %v2513_v40, 0 }
 0xb19   : > { %v4472_v25 = vpop.eup %4471  ;;  %4132 = vmatpush3.bf16.msra.mxu1 %v2518_v54 }
 0xb1a   : > { %v2504_v43 = vmul.f32 %v4472_v25, %v4464_v23  ;;  %4143 = vmatprep.subr.bf16.mxu1 %v4799_v14  ;;  %v4364_v23 = vld [vmem:[#allocation10 + $0x10] sm:$0xff]  }
 0xb1b   : > { %v4299_v32 = vpop.permute.xlu0 %4298 }
 0xb1c   : > { %v2508_v35 = vpack.c.bf16 %v2504_v43, %v2504_v43  ;;  %v4301_v33 = vunpack.i.h.bf16 %v4299_v32  ;;  %v4300_v63 = vunpack.i.l.bf16 %v4299_v32 }
 0xb1e   : > { %4134 = vmatmul.mubr.msk.bf16.vlgmr.msra.gmra.mxu1 %vm1122_vm3, %v2508_v35  ;;  %v2753_v34 = vsel %vm930_vm1, %v5277_v48, %v4301_v33  ;;  %v2752_v40 = vsel %vm930_vm1, %v5275_v42, %v4300_v63 }
 0xb1f   : > { %4145 = vmatprep.mubr.msk.bf16.mxu1 %vm4800_vm0, %v4799_v14  ;;  %v4309_v56 = vpop.permute.xlu0 %4308 }
 0xb20   : > { %v4310_v6 = vunpack.i.l.bf16 %v4309_v56 }
 0xb21   : > { %v4474_v3 = vpop.eup %4473 }
 0xb22   : > { %v2506_v36 = vmul.f32 %v4474_v3, %v4466_v26  ;;  %v4366_v26 = vld [vmem:[#allocation10] sm:$0xff]   ;;  %v2757_v43 = vsel %vm2756_vm4, %v2752_v40, %v4310_v6 }
 0xb23   : > { %v4370_v40 = vld [vmem:[#allocation11 + $0x60] ss:$8 sps:$4 sm:$0xff]  }
 0xb24   : > { %v2510_v44 = vpack.c.bf16 %v2506_v36, %v2506_v36 }
 0xb45   : > { %v2493_v30 = vpop.xlane.xlu1 %2492 }
 0xb46   : > { %4475 = vrcp.f32 %v2493_v30 }
 0xb49   : > { %v2561_v28 = vpop.permute.xlu1 %2560 }
 0xb4a   : > { %v2566_v31 = vsel %vm1174_vm2, %v2561_v28, 0 }
 0xb4b   : > { %4138 = vmatpush3.bf16.msra.mxu0 %v2566_v31 }
 0xb4c   : > { %4149 = vmatprep.subr.bf16.mxu0 %v4799_v14 }
 0xb4d   : > { %v2609_v37 = vpop.permute.xlu1 %2608 }
 0xb4e   : > { %v2614_v41 = vsel %vm1174_vm2, %v2609_v37, 0 }
 0xb4f   : > { %4144 = vmatpush3.bf16.msra.mxu1 %v2614_v41 }
 0xb50   : > { %4155 = vmatprep.subr.bf16.mxu1 %v4359_v7 }
 0xb52   : > { %4146 = vmatmul.mubr.msk.bf16.vlgmr.msra.gmra.mxu1 %vm1122_vm3, %v2510_v44 }
 0xb53   : > { %v4476_v45 = vpop.eup %4475  ;;  %4156 = vmatpush3.bf16.msra.mxu1 %v4359_v7 }
 0xb54   : > { %v2505_v47 = vmul.f32 %v4476_v45, %v4468_v55 }
 0xb56   : > { %v2509_v50 = vpack.c.bf16 %v2505_v47, %v2505_v47 }
 0xb58   : > { %4140 = vmatmul.mubr.msk.bf16.vlgmr.msra.gmra.mxu0 %vm1122_vm3, %v2509_v50 }
 0xb59   : > { %4151 = vmatprep.mubr.msk.bf16.mxu0 %vm4800_vm0, %v4799_v14  ;;  %v4360_v14 = vld [vmem:[#allocation10 + $0x30] sm:$0xff]  }
 0xb5a   : > { %4157 = vmatprep.subr.bf16.mxu1 %v4360_v14 }
 0xb5b   : > { %4158 = vmatpush3.bf16.msra.mxu1 %v4360_v14 }
 0xb5c   : > { %4159 = vmatprep.subr.bf16.mxu1 %v4361_v12 }
 0xb5f   : > { %4160 = vmatpush3.bf16.msra.mxu1 %v4361_v12 }
 0xb60   : > { %4161 = vmatprep.subr.bf16.mxu1 %v4362_v20 }
 0xb63   : > { %4162 = vmatpush3.bf16.msra.mxu1 %v4362_v20 }
 0xb64   : > { %4163 = vmatprep.subr.bf16.mxu1 %v4363_v22 }
 0xb67   : > { %4164 = vmatpush3.bf16.msra.mxu1 %v4363_v22 }
 0xb68   : > { %4165 = vmatprep.subr.bf16.mxu1 %v4364_v23 }
 0xb6b   : > { %4166 = vmatpush3.bf16.msra.mxu1 %v4364_v23 }
 0xb6c   : > { %4167 = vmatprep.subr.bf16.mxu1 %v4365_v24 }
 0xb6f   : > { %4168 = vmatpush3.bf16.msra.mxu1 %v4365_v24 }
 0xb70   : > { %4169 = vmatprep.subr.bf16.mxu1 %v4366_v26 }
 0xb73   : > { %4170 = vmatpush3.bf16.msra.mxu1 %v4366_v26 }
 0xb7e   : > { %v2499_v52 = vpop.xlane.xlu1 %2498 }
 0xb7f   : > { %4477 = vrcp.f32 %v2499_v52 }
 0xb82   : > { %v2657_v57 = vpop.permute.xlu1 %2656 }
 0xb83   : > { %v2662_v58 = vsel %vm1174_vm2, %v2657_v57, 0 }
 0xb84   : > { %4150 = vmatpush3.bf16.msra.mxu0 %v2662_v58 }
 0xb86   : > { %v4304_v31 = vpop.permute.xlu1 %4303 }
 0xb87   : > { %v4306_v37 = vunpack.i.h.bf16 %v4304_v31  ;;  %v4305_v41 = vunpack.i.l.bf16 %v4304_v31  ;;  %v4382_v31 = vld [vmem:[#allocation11 + $0x20] ss:$8 sps:$4 sm:$0xff]  }
 0xb89   : > { %v2755_v42 = vsel %vm930_vm1, %v5283_v9, %v4306_v37  ;;  %v2754_v47 = vsel %vm930_vm1, %v5279_v49, %v4305_v41  ;;  %v3768_v9 = vld [vmem:[%s5762_s6] ss:$0 sm:$0xff]  ;;  %v4385_v37 = vld [vmem:[#allocation11 + $0x10] ss:$8 sps:$4 sm:$0xff]   ;;  %v4390_v41 = vld [vmem:[#allocation11 + $0x4] ss:$8 sps:$4 sm:$0xff]  }
 0xb8a   : > { %v4314_v36 = vpop.permute.xlu1 %4313 }
 0xb8b   : > { %v4316_v48 = vunpack.i.h.bf16 %v4314_v36  ;;  %v4315_v44 = vunpack.i.l.bf16 %v4314_v36  ;;  %v4387_v36 = vld [vmem:[#allocation11 + $0x14] ss:$8 sps:$4 sm:$0xff]  }
 0xb8c   : > { %v4478_v59 = vpop.eup %4477 }
 0xb8d   : > { %v2507_v60 = vmul.f32 %v4478_v59, %v4470_v51  ;;  %v4311_v51 = vunpack.i.h.bf16 %v4309_v56  ;;  %v2759_v57 = vsel %vm2756_vm4, %v2754_v47, %v4315_v44  ;;  %v2760_v58 = vsel %vm2756_vm4, %v2755_v42, %v4316_v48  ;;  %v4388_v48 = vld [vmem:[#allocation11] ss:$8 sps:$4 sm:$0xff]  }
 0xb8f   : > { %v2511_v61 = vpack.c.bf16 %v2507_v60, %v2507_v60  ;;  %v2758_v35 = vsel %vm2756_vm4, %v2753_v34, %v4311_v51  ;;  %v4372_v34 = vld [vmem:[#allocation11 + $0x64] ss:$8 sps:$4 sm:$0xff]  }
 0xb91   : > { %4152 = vmatmul.mubr.msk.bf16.vlgmr.msra.gmra.mxu0 %vm1122_vm3, %v2511_v61 }
 0xb92   : > { %3100 = vmatprep.mubr.bf16.mxu0 %v4798_v39 }
 0xbde   : > { %v2554_v0 = vpop.f32.mrf.mxu1 }
 0xbe0   : > { %v4135_v1 = vpop.f32.mrf.mxu1 }
 0xbe2   : > { %v2557_v2 = vpop.f32.mrf.mxu1 }
 0xbe4   : > { %v4136_v4 = vpop.f32.mrf.mxu1 }
 0xc12   : > { %v2650_v5 = vpop.f32.mrf.mxu1 }
 0xc14   : > { %v4147_v8 = vpop.f32.mrf.mxu1 }
 0xc16   : > { %v2653_v10 = vpop.f32.mrf.mxu1 }
 0xc17   : > { %v4520_v10 = vld [vmem:[%s5065_s5 + $0x10] sm:$0xff] }
 0xc18   : > { %v2602_v11 = vpop.f32.mrf.mxu0  ;;  %v4148_v18 = vpop.f32.mrf.mxu1 }
 0xc19   : > { %v4317_v13 = vpack.i.bf16 %v2602_v11, %v2554_v0  ;;  %v4521_v18 = vld [vmem:[%s5065_s5 + $0x8] sm:$0xff] }
 0xc1a   : > { %v4141_v19 = vpop.f32.mrf.mxu0 }
 0xc1b   : > { %4318 = vrot.lane.b32.xlu0 %v4317_v13, %s4801_s15  ;;  %v4522_v19 = vld [vmem:[%s5065_s5 + $0x18] sm:$0xff] }
 0xc1c   : > { %v2605_v38 = vpop.f32.mrf.mxu0 }
 0xc1d   : > { %v4367_v38 = vld [vmem:[#allocation11 + $0x70] ss:$8 sps:$4 sm:$0xff]  }
 0xc1e   : > { %v4142_v21 = vpop.f32.mrf.mxu0 }
 0xc1f   : > { %v4369_v21 = vld [vmem:[#allocation11 + $0x74] ss:$8 sps:$4 sm:$0xff]  }
 0xc20   : > { %3068 = vmatprep.subr.bf16.mxu0 %v4369_v21 }
 0xc21   : > { %3069 = vmatpush1.bf16.msra.mxu0 %v4367_v38 }
 0xc22   : > { %3070 = vmatprep.subr.bf16.mxu0 %v4372_v34  ;;  %v4402_v34 = vld [vmem:[#allocation13 + $0x10] sm:$0xff]  }
 0xc25   : > { %3071 = vmatpush1.bf16.msra.mxu0 %v4370_v40  ;;  %v4403_v40 = vld [vmem:[#allocation13 + $0x48] sm:$0xff]  }
 0xc51   : > { %v2698_v27 = vpop.f32.mrf.mxu0 }
 0xc52   : > { %v4322_v29 = vpack.i.bf16 %v2698_v27, %v2650_v5  ;;  %v4519_v5 = vld [vmem:[%s5065_s5] sm:$0xff] }
 0xc53   : > { %v4153_v46 = vpop.f32.mrf.mxu0 }
 0xc54   : > { %4323 = vrot.lane.b32.xlu1 %v4322_v29, %s4801_s15  ;;  %s541_s15 = scalar_lea.vmem [#allocation14], %s3690_s22 }
 0xc55   : > { %v2701_v53 = vpop.f32.mrf.mxu0  ;;  %s3547_s16 = sshll.u32 %s541_s15, 4  ;;  %s5707_s16 = int_to_ptr.vmem [resolvable:$true] %s3547_s16 }
 0xc56   : > { %s4707_s19 = scalar_lea.vmem %s5707_s16, 512  ;;  %p4714_p5 = scmp.lt.s32.totalorder %s5707_s16, %s4712_s11 }
 0xc57   : > { %v4154_v55 = vpop.f32.mrf.mxu0  ;;  %p4708_p12 = scmp.ne.s32.totalorder %s5707_s16, %s4707_s19  ;;  %p4715_p8 = scmp.lt.s32.totalorder %s4713_s29, %s4707_s19 }
 0xc59   : > { %p4709_p0 = pnand %p4708_p12, %p5808_p13  ;;  %p4716_p7 = por %p4715_p8, %p4714_p5 }
 0xc5b   : > { %p4710_p2 = pneg %p4709_p0 }
 0xc5d   : > { %p4717_p6 = pnand %p4716_p7, %p4710_p2 }
 0xc8d   : > { %v4319_v62 = vpop.permute.xlu0 %4318 }
 0xc8e   : > { %v4321_v54 = vunpack.i.h.bf16 %v4319_v62  ;;  %v4320_v25 = vunpack.i.l.bf16 %v4319_v62 }
 0xc90   : > { %v2762_v30 = vsel %vm2761_vm5, %v2757_v43, %v4320_v25  ;;  %v2763_v3 = vsel %vm2761_vm5, %v2758_v35, %v4321_v54  ;;  %v4375_v54 = vld [vmem:[#allocation11 + $0x54] ss:$8 sps:$4 sm:$0xff]   ;;  %v4373_v25 = vld [vmem:[#allocation11 + $0x50] ss:$8 sps:$4 sm:$0xff]   ;;  %v4378_v43 = vld [vmem:[#allocation11 + $0x44] ss:$8 sps:$4 sm:$0xff]  }
 0xc91   : > { %v2766_v28 = vpack.c.bf16 %v2763_v3, %v2762_v30  ;;  %3072 = vmatprep.subr.bf16.mxu0 %v4375_v54  ;;  %v4376_v35 = vld [vmem:[#allocation11 + $0x40] ss:$8 sps:$4 sm:$0xff]   ;;  %v4379_v30 = vld [vmem:[#allocation11 + $0x30] ss:$8 sps:$4 sm:$0xff]   ;;  %v4381_v3 = vld [vmem:[#allocation11 + $0x34] ss:$8 sps:$4 sm:$0xff]  }
 0xc92   : > { %3073 = vmatpush1.bf16.msra.mxu0 %v4373_v25  ;;  %v4404_v54 = vld [vmem:[#allocation13 + $0x8] sm:$0xff]   ;;  %v4405_v25 = vld [vmem:[#allocation13 + $0x40] sm:$0xff]  }
 0xc93   : > { %4171 = vmatprep.mubr.bf16.mxu1 %v2766_v28  ;;  %3074 = vmatprep.subr.bf16.mxu0 %v4378_v43  ;;  %v4384_v28 = vld [vmem:[#allocation11 + $0x24] ss:$8 sps:$4 sm:$0xff]  }
 0xc94   : > { %v4406_v43 = vld [vmem:[#allocation13] sm:$0xff]  }
 0xc96   : > { %3075 = vmatpush1.bf16.msra.mxu0 %v4376_v35  ;;  %v2976_v35 = vld [vmem:[%s5766_s10] sm:$0x3] }
 0xc97   : > { %3076 = vmatprep.subr.bf16.mxu0 %v4381_v3  ;;  %v2985_v3 = vrot.slane %v2976_v35, %v658_v17 }
 0xc9a   : > { %3077 = vmatpush1.bf16.msra.mxu0 %v4379_v30  ;;  %v2981_v30 = vrot.slane %v2976_v35, %v654_v16 }
 0xc9b   : > { %3078 = vmatprep.subr.bf16.mxu0 %v4384_v28 }
 0xc9e   : > { %3079 = vmatpush1.bf16.msra.mxu0 %v4382_v31 }
 0xc9f   : > { %3080 = vmatprep.subr.bf16.mxu0 %v4387_v36 }
 0xca2   : > { %3081 = vmatpush1.bf16.msra.mxu0 %v4385_v37 }
 0xca3   : > { %3082 = vmatprep.subr.bf16.mxu0 %v4390_v41 }
 0xca6   : > { %3083 = vmatpush1.bf16.msra.mxu0 %v4388_v48 }
 0xcc6   : > { %v4324_v45 = vpop.permute.xlu1 %4323 }
 0xcc7   : > { %v4326_v50 = vunpack.i.h.bf16 %v4324_v45  ;;  %v4325_v52 = vunpack.i.l.bf16 %v4324_v45 }
 0xcc9   : > { %v2765_v59 = vsel %vm2761_vm5, %v2760_v58, %v4326_v50  ;;  %v2764_v60 = vsel %vm2761_vm5, %v2759_v57, %v4325_v52 }
 0xcca   : > { %v2767_v61 = vpack.c.bf16 %v2765_v59, %v2764_v60 }
 0xccc   : > { %4172 = vmatmul.mubr.bf16.vlgmr.msra.gmra.mxu1 %v2767_v61 }
 0xd8c   : > { %v4173_v0 = vpop.f32.mrf.mxu1 }
 0xd8d   : > { %v2882_v4 = vadd.f32 %v4173_v0, %v3768_v9 }
 0xd8e   : > { %v2873_v49 = vpop.f32.mrf.mxu1 }
 0xd8f   : > { %v2874_v1 = vadd.f32 %v3768_v9, %v2873_v49  ;;  %v5512_v12 = vadd.f32 %v4520_v10, %v2882_v4 }
 0xd90   : > { %v4174_v2 = vpop.f32.mrf.mxu1 }
 0xd91   : > { %v5508_v7 = vadd.f32 %v4519_v5, %v2874_v1  ;;  %v2885_v11 = vadd.f32 %v4174_v2, %v3768_v9  ;;  %v3777_v1 = vld [vmem:[%s5763_s7] ss:$0 sm:$0xff] }
 0xd92   : > { %v2876_v14 = vpop.f32.mrf.mxu1 }
 0xd93   : > { %v2877_v8 = vadd.f32 %v3768_v9, %v2876_v14  ;;  %2894 = vadd.xlane.f32.xlu0 %v5508_v7  ;;  %v5520_v20 = vadd.f32 %v4522_v19, %v2885_v11 }
 0xd95   : > { %v5515_v13 = vadd.f32 %v4521_v18, %v2877_v8  ;;  %v3778_v8 = vld [vmem:[%s5764_s8] ss:$0 sm:$0xff] }
 0xd97   : > { %2896 = vadd.xlane.f32.xlu1 %v5515_v13  ;;  %2898 = vadd.xlane.f32.xlu0 %v5512_v12 }
 0xd9b   : > { %2900 = vadd.xlane.f32.xlu0 %v5520_v20 }
 0xe1c   : > { %v2895_v22 = vpop.xlane.xlu0 %2894 }
 0xe1d   : > { %v2902_v23 = vmul.f32 0.0078125, %v2895_v22 }
 0xe1f   : > { %v5524_v24 = vsub.f32 %v5508_v7, %v2902_v23 }
 0xe20   : > { %v2897_v26 = vpop.xlane.xlu1 %2896  ;;  %v2899_v27 = vpop.xlane.xlu0 %2898 }
 0xe21   : > { %v2903_v29 = vmul.f32 0.0078125, %v2897_v26  ;;  %v2904_v46 = vmul.f32 0.0078125, %v2899_v27  ;;  %v2910_v53 = vmul.f32 %v5524_v24, %v5524_v24 }
 0xe23   : > { %v2907_v55 = vsub.f32 %v5515_v13, %v2903_v29  ;;  %v5530_v32 = vsub.f32 %v5512_v12, %v2904_v46  ;;  %2914 = vadd.xlane.f32.xlu0 %v2910_v53  ;;  %v4391_v46 = vld [vmem:[#allocation13 + $0x78] sm:$0xff]  }
 0xe24   : > { %v2901_v56 = vpop.xlane.xlu0 %2900  ;;  %v4392_v53 = vld [vmem:[#allocation13 + $0x38] sm:$0xff]   ;;  %3915 = vmatprep.subr.bf16.mxu1 %v4391_v46 }
 0xe25   : > { %v2905_v33 = vmul.f32 0.0078125, %v2901_v56  ;;  %v2911_v63 = vmul.f32 %v2907_v55, %v2907_v55  ;;  %v2912_v51 = vmul.f32 %v5530_v32, %v5530_v32  ;;  %3916 = vmatpush3.bf16.msra.mxu1 %v4392_v53  ;;  %v4394_v56 = vld [vmem:[#allocation13 + $0x30] sm:$0xff]  }
 0xe27   : > { %v2909_v6 = vsub.f32 %v5520_v20, %v2905_v33  ;;  %2916 = vadd.xlane.f32.xlu1 %v2911_v63  ;;  %2918 = vadd.xlane.f32.xlu0 %v2912_v51  ;;  %v4396_v33 = vld [vmem:[#allocation13 + $0x28] sm:$0xff]   ;;  %v4397_v63 = vld [vmem:[#allocation13 + $0x60] sm:$0xff]  }
 0xe28   : > { %v4398_v51 = vld [vmem:[#allocation13 + $0x20] sm:$0xff]  }
 0xe29   : > { %v2913_v62 = vmul.f32 %v2909_v6, %v2909_v6 }
 0xe2b   : > { %2920 = vadd.xlane.f32.xlu1 %v2913_v62  ;;  %v4401_v62 = vld [vmem:[#allocation13 + $0x50] sm:$0xff]  }
 0xeac   : > { %v2915_v44 = vpop.xlane.xlu0 %2914 }
 0xead   : > { %v2922_v45 = vmul.f32 0.0078125, %v2915_v44 }
 0xeaf   : > { %v2926_v42 = vadd.f32 1e-05, %v2922_v45 }
 0xeb0   : > { %v2917_v47 = vpop.xlane.xlu1 %2916  ;;  %v2919_v50 = vpop.xlane.xlu0 %2918 }
 0xeb1   : > { %4479 = vrsqrt.f32 %v2926_v42  ;;  %v2923_v52 = vmul.f32 0.0078125, %v2917_v47  ;;  %v2924_v57 = vmul.f32 0.0078125, %v2919_v50 }
 0xeb3   : > { %v2927_v58 = vadd.f32 1e-05, %v2923_v52  ;;  %v2928_v59 = vadd.f32 1e-05, %v2924_v57 }
 0xeb4   : > { %v2921_v60 = vpop.xlane.xlu1 %2920 }
 0xeb5   : > { %4481 = vrsqrt.f32 %v2927_v58  ;;  %v2925_v61 = vmul.f32 0.0078125, %v2921_v60 }
 0xeb6   : > { %4483 = vrsqrt.f32 %v2928_v59 }
 0xeb7   : > { %v2929_v0 = vadd.f32 1e-05, %v2925_v61 }
 0xeb9   : > { %4485 = vrsqrt.f32 %v2929_v0 }
 0xebe   : > { %v4480_v9 = vpop.eup %4479 }
 0xebf   : > { %v2934_v49 = vmul.f32 %v4480_v9, %v5524_v24 }
 0xec1   : > { %v2944_v5 = vmul.f32 %v3777_v1, %v2934_v49 }
 0xec2   : > { %v4482_v2 = vpop.eup %4481 }
 0xec3   : > { %v2935_v4 = vmul.f32 %v4482_v2, %v2907_v55  ;;  %v4484_v14 = vpop.eup %4483  ;;  %v2954_v18 = vadd.f32 %v3778_v8, %v2944_v5  ;;  %v4393_v55 = vld [vmem:[#allocation13 + $0x70] sm:$0xff]  }
 0xec4   : > { %v2936_v38 = vmul.f32 %v4484_v14, %v5530_v32  ;;  %3917 = vmatprep.subr.bf16.mxu1 %v4393_v55  ;;  %v4395_v32 = vld [vmem:[#allocation13 + $0x68] sm:$0xff]  }
 0xec5   : > { %v2945_v10 = vmul.f32 %v3777_v1, %v2935_v4  ;;  %3918 = vmatpush3.bf16.msra.mxu1 %v4394_v56 }
 0xec6   : > { %v4486_v11 = vpop.eup %4485  ;;  %v2946_v24 = vmul.f32 %v3777_v1, %v2936_v38  ;;  %3919 = vmatprep.subr.bf16.mxu1 %v4395_v32 }
 0xec7   : > { %v2955_v19 = vadd.f32 %v3778_v8, %v2945_v10  ;;  %v2937_v21 = vmul.f32 %v4486_v11, %v2909_v6  ;;  %v4400_v6 = vld [vmem:[#allocation13 + $0x18] sm:$0xff]  }
 0xec8   : > { %v2956_v27 = vadd.f32 %v3778_v8, %v2946_v24 }
 0xec9   : > { %v2958_v22 = vpack.c.bf16 %v2955_v19, %v2954_v18  ;;  %v2947_v23 = vmul.f32 %v3777_v1, %v2937_v21  ;;  %3920 = vmatpush3.bf16.msra.mxu1 %v4396_v33 }
 0xeca   : > { %3921 = vmatprep.subr.bf16.mxu1 %v4397_v63 }
 0xecb   : > { %3101 = vmatmul.mubr.bf16.vlgmr.msra.gmra.mxu0 %v2958_v22  ;;  %v2957_v26 = vadd.f32 %v3778_v8, %v2947_v23 }
 0xecc   : > { %3110 = vmatprep.mubr.bf16.mxu0 %v4798_v39  ;;  %v4399_v39 = vld [vmem:[#allocation13 + $0x58] sm:$0xff]  }
 0xecd   : > { %v2959_v29 = vpack.c.bf16 %v2957_v26, %v2956_v27  ;;  %3922 = vmatpush3.bf16.msra.mxu1 %v4398_v51 }
 0xece   : > { %3923 = vmatprep.subr.bf16.mxu1 %v4399_v39 }
 0xed1   : > { %3924 = vmatpush3.bf16.msra.mxu1 %v4400_v6 }
 0xed2   : > { %3925 = vmatprep.subr.bf16.mxu1 %v4401_v62 }
 0xed3   : > { %3111 = vmatmul.mubr.bf16.gmra.mxu0 %v2959_v29 }
 0xed5   : > { %3926 = vmatpush3.bf16.msra.mxu1 %v4402_v34 }
 0xed6   : > { %3927 = vmatprep.subr.bf16.mxu1 %v4403_v40 }
 0xed9   : > { %3928 = vmatpush3.bf16.msra.mxu1 %v4404_v54 }
 0xeda   : > { %3929 = vmatprep.subr.bf16.mxu1 %v4405_v25 }
 0xedd   : > { %3930 = vmatpush3.bf16.msra.mxu1 %v4406_v43 }
 0xf8b   : > { %v3102_v28 = vpop.f32.mrf.mxu0 }
 0xf8c   : > { %v5551_v31 = vadd.f32 %v3102_v28, %v2981_v30 }
 0xf8d   : > { %v3104_v36 = vpop.f32.mrf.mxu0 }
 0xf8e   : > { %v5554_v37 = vmul.f32 0.70710677, %v5551_v31  ;;  %v5556_v41 = vadd.f32 %v3104_v36, %v2985_v3 }
 0xf8f   : > { %v3106_v48 = vpop.f32.mrf.mxu0 }
 0xf90   : > { %v3153_v44 = vand.u32 2147483647, %v5554_v37  ;;  %v5560_v45 = vmul.f32 0.70710677, %v5556_v41  ;;  %v5562_v42 = vadd.f32 %v3106_v48, %v2981_v30  ;;  %vm3137_vm6 = vcmp.ge.f32.partialorder %v5554_v37, 0.0 }
 0xf91   : > { %v3108_v16 = vpop.f32.mrf.mxu0 }
 0xf92   : > { %v3161_v15 = vmul.f32 0.3275911, %v3153_v44  ;;  %v3154_v17 = vand.u32 2147483647, %v5560_v45  ;;  %v5566_v47 = vmul.f32 0.70710677, %v5562_v42  ;;  %v5568_v50 = vadd.f32 %v3108_v16, %v2985_v3 }
 0xf93   : > { %v3112_v52 = vpop.f32.mrf.mxu0  ;;  %v3265_v8 = vsub.f32 0.0, %v3153_v44  ;;  %vm3138_vm7 = vcmp.ge.f32.partialorder %v5560_v45, 0.0 }
 0xf94   : > { %v3169_v57 = vadd.f32 1.0, %v3161_v15  ;;  %v3162_v58 = vmul.f32 0.3275911, %v3154_v17  ;;  %v3155_v59 = vand.u32 2147483647, %v5566_v47  ;;  %v5575_v2 = vadd.f32 %v3112_v52, %v2981_v30 }
 0xf95   : > { %v5572_v60 = vmul.f32 0.70710677, %v5568_v50  ;;  %v3114_v61 = vpop.f32.mrf.mxu0  ;;  %v3266_v19 = vsub.f32 0.0, %v3154_v17  ;;  %v3273_v23 = vmul.f32 %v3265_v8, %v3153_v44  ;;  %vm3139_vm8 = vcmp.ge.f32.partialorder %v5566_v47, 0.0 }
 0xf96   : > { %4487 = vrcp.f32 %v3169_v57  ;;  %v3170_v0 = vadd.f32 1.0, %v3162_v58  ;;  %v3163_v9 = vmul.f32 0.3275911, %v3155_v59  ;;  %v5577_v14 = vadd.f32 %v3114_v61, %v2985_v3 }
 0xf97   : > { %v3156_v49 = vand.u32 2147483647, %v5572_v60  ;;  %v3116_v4 = vpop.f32.mrf.mxu0  ;;  %v5580_v10 = vmul.f32 0.70710677, %v5575_v2  ;;  %v3267_v27 = vsub.f32 0.0, %v3155_v59  ;;  %v3274_v53 = vmul.f32 %v3266_v19, %v3154_v17 }
 0xf98   : > { %4489 = vrcp.f32 %v3170_v0  ;;  %v3171_v1 = vadd.f32 1.0, %v3163_v9  ;;  %v5583_v18 = vmul.f32 0.70710677, %v5577_v14  ;;  %v5586_v21 = vadd.f32 %v3116_v4, %v2981_v30 }
 0xf99   : > { %v3164_v5 = vmul.f32 0.3275911, %v3156_v49  ;;  %v3157_v38 = vand.u32 2147483647, %v5580_v10  ;;  %v3118_v22 = vpop.f32.mrf.mxu0  ;;  %v3281_v51 = vmul.f32 1.442695, %v3273_v23  ;;  %v3275_v62 = vmul.f32 %v3267_v27, %v3155_v59 }
 0xf9a   : > { %4491 = vrcp.f32 %v3171_v1  ;;  %v3158_v26 = vand.u32 2147483647, %v5583_v18  ;;  %v5590_v29 = vmul.f32 0.70710677, %v5586_v21  ;;  %v5592_v46 = vadd.f32 %v3118_v22, %v2985_v3 }
 0xf9b   : > { %v3172_v11 = vadd.f32 1.0, %v3164_v5  ;;  %v3165_v24 = vmul.f32 0.3275911, %v3157_v38  ;;  %v3268_v34 = vsub.f32 0.0, %v3156_v49  ;;  %v3283_v54 = vmul.f32 1.442695, %v3274_v53 }
 0xf9c   : > { %v3166_v56 = vmul.f32 0.3275911, %v3158_v26  ;;  %v3159_v32 = vand.u32 2147483647, %v5590_v29  ;;  %v5596_v33 = vmul.f32 0.70710677, %v5592_v46 }
 0xf9d   : > { %4493 = vrcp.f32 %v3172_v11  ;;  %v3173_v55 = vadd.f32 1.0, %v3165_v24  ;;  %v3269_v30 = vsub.f32 0.0, %v3157_v38  ;;  %v3285_v16 = vmul.f32 1.442695, %v3275_v62 }
 0xf9e   : > { %v3174_v39 = vadd.f32 1.0, %v3166_v56  ;;  %v3167_v40 = vmul.f32 0.3275911, %v3159_v32  ;;  %v5603_v25 = vand.u32 2147483647, %v5596_v33  ;;  %v3276_v15 = vmul.f32 %v3268_v34, %v3156_v49 }
 0xf9f   : > { %4495 = vrcp.f32 %v3173_v55  ;;  %v3270_v57 = vsub.f32 0.0, %v3158_v26  ;;  %v4804_v59 = vmov -1.0   ;;  %v3277_v9 = vmul.f32 %v3269_v30, %v3157_v38 }
 0xfa0   : > { %4497 = vrcp.f32 %v3174_v39  ;;  %v3175_v3 = vadd.f32 1.0, %v3167_v40  ;;  %v3168_v36 = vmul.f32 0.3275911, %v5603_v25  ;;  %v5617_v61 = vsel %vm3137_vm6, 1.0, %v4804_v59 }
 0xfa1   : > { %4499 = vpow2.f32 %v3281_v51  ;;  %v3271_v5 = vsub.f32 0.0, %v3159_v32  ;;  %v5626_v11 = vsel %vm3138_vm7, 1.0, %v4804_v59  ;;  %v3287_v19 = vmul.f32 1.442695, %v3276_v15 }
 0xfa2   : > { %4501 = vrcp.f32 %v3175_v3  ;;  %v3176_v58 = vadd.f32 1.0, %v3168_v36  ;;  %v3278_v23 = vmul.f32 %v3270_v57, %v3158_v26  ;;  %v3289_v53 = vmul.f32 1.442695, %v3277_v9 }
 0xfa3   : > { %v5598_v63 = vpop.eup %4487  ;;  %4503 = vpow2.f32 %v3283_v54  ;;  %v3279_v51 = vmul.f32 %v3271_v5, %v3159_v32  ;;  %v3272_v62 = vsub.f32 0.0, %v5603_v25  ;;  %v3147_v47 = vsel %vm3139_vm8, 1.0, %v4804_v59 }
 0xfa4   : > { %v3193_v6 = vmul.f32 1.0614054, %v5598_v63  ;;  %4505 = vrcp.f32 %v3176_v58  ;;  %v3291_v54 = vmul.f32 1.442695, %v3278_v23  ;;  %vm3140_vm9 = vcmp.ge.f32.partialorder %v5572_v60, 0.0 }
 0xfa5   : > { %v5605_v43 = vpop.eup %4489  ;;  %4507 = vpow2.f32 %v3285_v16  ;;  %v3280_v57 = vmul.f32 %v3272_v62, %v5603_v25  ;;  %vm3141_vm10 = vcmp.ge.f32.partialorder %v5580_v10, 0.0  ;;  %vm3142_vm11 = vcmp.ge.f32.partialorder %v5583_v18, 0.0 }
 0xfa6   : > { %v3201_v35 = vadd.f32 -1.4531521, %v3193_v6  ;;  %v3194_v28 = vmul.f32 1.0614054, %v5605_v43  ;;  %4509 = vpow2.f32 %v3287_v19  ;;  %vm3143_vm12 = vcmp.ge.f32.partialorder %v5590_v29, 0.0 }
 0xfa7   : > { %v5610_v48 = vpop.eup %4491  ;;  %4511 = vpow2.f32 %v3289_v53  ;;  %v3295_v53 = vmul.f32 1.442695, %v3280_v57  ;;  %v3151_v29 = vsel %vm3143_vm12, 1.0, %v4804_v59  ;;  %vm3144_vm13 = vcmp.ge.f32.partialorder %v5596_v33, 0.0 }
 0xfa8   : > { %v3209_v44 = vmul.f32 %v5598_v63, %v3201_v35  ;;  %v3202_v17 = vadd.f32 -1.4531521, %v3194_v28  ;;  %v3195_v52 = vmul.f32 1.0614054, %v5610_v48  ;;  %4513 = vpow2.f32 %v3291_v54 }
 0xfa9   : > { %v3125_v33 = vmul.f32 0.5, %v5575_v2 }
 0xfaa   : > { %v3217_v0 = vadd.f32 1.4214138, %v3209_v44  ;;  %v5619_v1 = vpop.eup %4493  ;;  %v3210_v4 = vmul.f32 %v5605_v43, %v3202_v17  ;;  %v3203_v49 = vadd.f32 -1.4531521, %v3195_v52  ;;  %v3293_v44 = vmul.f32 1.442695, %v3279_v51 }
 0xfab   : > { %v3196_v37 = vmul.f32 1.0614054, %v5619_v1 }
 0xfac   : > { %v3225_v8 = vmul.f32 %v5598_v63, %v3217_v0  ;;  %v3218_v22 = vadd.f32 1.4214138, %v3210_v4  ;;  %v3211_v38 = vmul.f32 %v5610_v48, %v3203_v49  ;;  %v5632_v45 = vpop.eup %4495  ;;  %4515 = vpow2.f32 %v3293_v44 }
 0xfad   : > { %v3204_v27 = vadd.f32 -1.4531521, %v3196_v37  ;;  %v3197_v40 = vmul.f32 1.0614054, %v5632_v45  ;;  %v5640_v32 = vpop.eup %4497  ;;  %4517 = vpow2.f32 %v3295_v53 }
 0xfae   : > { %v3233_v24 = vadd.f32 -0.28449672, %v3225_v8  ;;  %v3226_v55 = vmul.f32 %v5605_v43, %v3218_v22  ;;  %v3219_v56 = vadd.f32 1.4214138, %v3211_v38  ;;  %v4500_v16 = vpop.eup %4499  ;;  %v3198_v52 = vmul.f32 1.0614054, %v5640_v32 }
 0xfaf   : > { %v3212_v6 = vmul.f32 %v5619_v1, %v3204_v27  ;;  %v3205_v36 = vadd.f32 -1.4531521, %v3197_v40  ;;  %v5647_v58 = vpop.eup %4501 }
 0xfb0   : > { %v3241_v39 = vmul.f32 %v5598_v63, %v3233_v24  ;;  %v3234_v34 = vadd.f32 -0.28449672, %v3226_v55  ;;  %v3227_v26 = vmul.f32 %v5610_v48, %v3219_v56  ;;  %v3206_v8 = vadd.f32 -1.4531521, %v3198_v52 }
 0xfb1   : > { %v3220_v30 = vadd.f32 1.4214138, %v3212_v6  ;;  %v3213_v4 = vmul.f32 %v5632_v45, %v3205_v36  ;;  %v3199_v37 = vmul.f32 1.0614054, %v5647_v58 }
 0xfb2   : > { %v3249_v35 = vadd.f32 0.2548296, %v3241_v39  ;;  %v3242_v3 = vmul.f32 %v5605_v43, %v3234_v34  ;;  %v3235_v28 = vadd.f32 -0.28449672, %v3227_v26  ;;  %v3214_v24 = vmul.f32 %v5640_v32, %v3206_v8 }
 0xfb3   : > { %v3228_v17 = vmul.f32 %v5619_v1, %v3220_v30  ;;  %v3221_v38 = vadd.f32 1.4214138, %v3213_v4  ;;  %v3207_v27 = vadd.f32 -1.4531521, %v3199_v37  ;;  %v3122_v8 = vmul.f32 0.5, %v5556_v41 }
 0xfb4   : > { %v3257_v15 = vmul.f32 %v5598_v63, %v3249_v35  ;;  %v3250_v0 = vadd.f32 0.2548296, %v3242_v3  ;;  %v3243_v9 = vmul.f32 %v5610_v48, %v3235_v28  ;;  %v4504_v63 = vpop.eup %4503  ;;  %v3222_v34 = vadd.f32 1.4214138, %v3214_v24 }
 0xfb5   : > { %v3236_v5 = vadd.f32 -0.28449672, %v3228_v17  ;;  %v5653_v25 = vpop.eup %4505  ;;  %v3229_v51 = vmul.f32 %v5632_v45, %v3221_v38  ;;  %v3215_v26 = vmul.f32 %v5647_v58, %v3207_v27 }
 0xfb6   : > { %v3297_v49 = vmul.f32 %v4500_v16, %v3257_v15  ;;  %v3258_v19 = vmul.f32 %v5605_v43, %v3250_v0  ;;  %v3251_v22 = vadd.f32 0.2548296, %v3243_v9  ;;  %v3200_v39 = vmul.f32 1.0614054, %v5653_v25  ;;  %v4508_v6 = vpop.eup %4507 }
 0xfb7   : > { %v3244_v23 = vmul.f32 %v5619_v1, %v3236_v5  ;;  %v3237_v35 = vadd.f32 -0.28449672, %v3229_v51  ;;  %v3223_v28 = vadd.f32 1.4214138, %v3215_v26  ;;  %v4510_v36 = vpop.eup %4509 }
 0xfb8   : > { %v3298_v55 = vmul.f32 %v4504_v63, %v3258_v19  ;;  %v3259_v56 = vmul.f32 %v5610_v48, %v3251_v22  ;;  %v3305_v43 = vsub.f32 1.0, %v3297_v49  ;;  %v3208_v30 = vadd.f32 -1.4531521, %v3200_v39  ;;  %v4512_v9 = vpop.eup %4511 }
 0xfb9   : > { %v3252_v62 = vadd.f32 0.2548296, %v3244_v23  ;;  %v3230_v48 = vmul.f32 %v5640_v32, %v3222_v34  ;;  %v3245_v16 = vmul.f32 %v5632_v45, %v3237_v35  ;;  %v3231_v0 = vmul.f32 %v5647_v58, %v3223_v28  ;;  %v4514_v24 = vpop.eup %4513 }
 0xfba   : > { %v3306_v40 = vsub.f32 1.0, %v3298_v55  ;;  %v3299_v54 = vmul.f32 %v4508_v6, %v3259_v56  ;;  %v3216_v15 = vmul.f32 %v5653_v25, %v3208_v30  ;;  %v3313_v4 = vmul.f32 %v3305_v43, %v5617_v61  ;;  %v4516_v39 = vpop.eup %4515 }
 0xfbb   : > { %v3260_v3 = vmul.f32 %v5619_v1, %v3252_v62  ;;  %v3238_v57 = vadd.f32 -0.28449672, %v3230_v48  ;;  %v3253_v49 = vadd.f32 0.2548296, %v3245_v16  ;;  %v3239_v19 = vadd.f32 -0.28449672, %v3231_v0 }
 0xfbc   : > { %v3307_v44 = vsub.f32 1.0, %v3299_v54  ;;  %v3314_v17 = vmul.f32 %v3306_v40, %v5626_v11  ;;  %v3224_v5 = vadd.f32 1.4214138, %v3216_v15  ;;  %v3148_v11 = vsel %vm3140_vm9, 1.0, %v4804_v59 }
 0xfbd   : > { %v3300_v52 = vmul.f32 %v4510_v36, %v3260_v3  ;;  %v3246_v63 = vmul.f32 %v5640_v32, %v3238_v57  ;;  %v3261_v38 = vmul.f32 %v5632_v45, %v3253_v49  ;;  %v3247_v53 = vmul.f32 %v5647_v58, %v3239_v19 }
 0xfbe   : > { %v3315_v1 = vmul.f32 %v3307_v44, %v3147_v47  ;;  %v3232_v23 = vmul.f32 %v5653_v25, %v3224_v5  ;;  %v3322_v61 = vadd.f32 1.0, %v3314_v17  ;;  %v3321_v41 = vadd.f32 1.0, %v3313_v4  ;;  %v4518_v44 = vpop.eup %4517 }
 0xfbf   : > { %v3308_v37 = vsub.f32 1.0, %v3300_v52  ;;  %v3254_v27 = vadd.f32 0.2548296, %v3246_v63  ;;  %v3123_v55 = vmul.f32 0.5, %v5562_v42  ;;  %v3124_v56 = vmul.f32 0.5, %v5568_v50 }
 0xfc0   : > { %v3323_v22 = vadd.f32 1.0, %v3315_v1  ;;  %v3240_v51 = vadd.f32 -0.28449672, %v3232_v23  ;;  %v3301_v60 = vmul.f32 %v4512_v9, %v3261_v38  ;;  %v3255_v45 = vadd.f32 0.2548296, %v3247_v53 }
 0xfc1   : > { %v3316_v47 = vmul.f32 %v3308_v37, %v3148_v11  ;;  %v3262_v43 = vmul.f32 %v5640_v32, %v3254_v27  ;;  %v3121_v62 = vmul.f32 0.5, %v5551_v31  ;;  %v3330_v40 = vmul.f32 %v3322_v61, %v3122_v8 }
 0xfc2   : > { %v3331_v34 = vmul.f32 %v3323_v22, %v3123_v55  ;;  %v3248_v26 = vmul.f32 %v5653_v25, %v3240_v51  ;;  %v3263_v42 = vmul.f32 %v5647_v58, %v3255_v45  ;;  %v3309_v32 = vsub.f32 1.0, %v3301_v60 }
 0xfc3   : > { %v3324_v6 = vadd.f32 1.0, %v3316_v47  ;;  %v3302_v35 = vmul.f32 %v4514_v24, %v3262_v43  ;;  %v3329_v50 = vmul.f32 %v3321_v41, %v3121_v62  ;;  %v3149_v16 = vsel %vm3141_vm10, 1.0, %v4804_v59 }
 0xfc4   : > { %v3256_v30 = vadd.f32 0.2548296, %v3248_v26  ;;  %v3303_v48 = vmul.f32 %v4516_v39, %v3263_v42  ;;  %v3150_v58 = vsel %vm3142_vm11, 1.0, %v4804_v59  ;;  %v3317_v52 = vmul.f32 %v3309_v32, %v3149_v16 }
 0xfc5   : > { %v3332_v54 = vmul.f32 %v3324_v6, %v3124_v56  ;;  %v3310_v3 = vsub.f32 1.0, %v3302_v35  ;;  %v3337_v28 = vpack.c.bf16 %v3331_v34, %v3329_v50  ;;  %v3152_v9 = vsel %vm3144_vm13, 1.0, %v4804_v59 }
 0xfc6   : > { %v3264_v36 = vmul.f32 %v5653_v25, %v3256_v30  ;;  %v3311_v15 = vsub.f32 1.0, %v3303_v48  ;;  %v3325_v1 = vadd.f32 1.0, %v3317_v52  ;;  %v3127_v49 = vmul.f32 0.5, %v5586_v21  ;;  %v3795_v21 = vld [vmem:[%s5768_s12] ss:$0 sm:$0xff] }
 0xfc7   : > { %v3338_v31 = vpack.c.bf16 %v3332_v54, %v3330_v40  ;;  %v3318_v18 = vmul.f32 %v3310_v3, %v3150_v58  ;;  %v3126_v5 = vmul.f32 0.5, %v5577_v14  ;;  %v3128_v8 = vmul.f32 0.5, %v5592_v46 }
 0xfc8   : > { %v3304_v17 = vmul.f32 %v4518_v44, %v3264_v36  ;;  %v3319_v57 = vmul.f32 %v3311_v15, %v3151_v29  ;;  %v3333_v11 = vmul.f32 %v3325_v1, %v3125_v33 }
 0xfc9   : > { %3508 = vmatprep.mubr.bf16.mxu1 %v3338_v31  ;;  %v3326_v4 = vadd.f32 1.0, %v3318_v18 }
 0xfca   : > { %3509 = vmatmul.mubr.bf16.vlgmr.msra.gmra.mxu1 %v3337_v28  ;;  %v3312_v0 = vsub.f32 1.0, %v3304_v17  ;;  %v3327_v25 = vadd.f32 1.0, %v3319_v57 }
 0xfcb   : > { %v3334_v19 = vmul.f32 %v3326_v4, %v3126_v5 }
 0xfcc   : > { %v3320_v10 = vmul.f32 %v3312_v0, %v3152_v9  ;;  %v3335_v63 = vmul.f32 %v3327_v25, %v3127_v49 }
 0xfce   : > { %v3328_v37 = vadd.f32 1.0, %v3320_v10  ;;  %v3339_v23 = vpack.c.bf16 %v3335_v63, %v3333_v11 }
 0xfd0   : > { %v3336_v22 = vmul.f32 %v3328_v37, %v3128_v8 }
 0xfd2   : > { %v3340_v38 = vpack.c.bf16 %v3336_v22, %v3334_v19 }
 0xfd4   : > { %3516 = vmatprep.mubr.bf16.mxu1 %v3340_v38 }
 0xfd5   : > { %3517 = vmatmul.mubr.bf16.gmra.mxu1 %v3339_v23 }
0x108a   : > { %v3931_v59 = vpop.f32.mrf.mxu1 }
0x108c   : > { %v3932_v14 = vpop.f32.mrf.mxu1 }
0x108d   : > { %v3933_v24 = vadd.f32 %v3932_v14, %v3931_v59 }
0x108e   : > { %v3934_v46 = vpop.f32.mrf.mxu1 }
0x108f   : > { %v3511_v61 = vadd.f32 %v3933_v24, %v3795_v21 }
0x1090   : > { %v3935_v47 = vpop.f32.mrf.mxu1 }
0x1091   : > { %v3525_v2 = vadd.f32 %v3511_v61, %v5508_v7  ;;  %v3936_v27 = vadd.f32 %v3935_v47, %v3934_v46 }
0x1093   : > { %3529 = vst [vmem:[%s541_s15] sm:$0xff] %v3525_v2  ;;  %v3514_v53 = vadd.f32 %v3936_v27, %v3795_v21 }
0x1095   : > { %v3526_v41 = vadd.f32 %v3514_v53, %v5515_v13  ;;  %v3937_v55 = vpop.f32.mrf.mxu1 }
0x1097   : > { %3530 = vst [vmem:[%s541_s15 + $0x8] sm:$0xff] %v3526_v41  ;;  %v3938_v56 = vpop.f32.mrf.mxu1 }
0x1098   : > { %v3939_v51 = vadd.f32 %v3938_v56, %v3937_v55 }
0x1099   : > { %v3940_v39 = vpop.f32.mrf.mxu1 }
0x109a   : > { %v3519_v6 = vadd.f32 %v3939_v51, %v3795_v21 }
0x109b   : > { %v3941_v60 = vpop.f32.mrf.mxu1 }
0x109c   : > { %v3527_v7 = vadd.f32 %v3519_v6, %v5512_v12  ;;  %v3942_v43 = vadd.f32 %v3941_v60, %v3940_v39 }
0x109e   : > { %3531 = vst [vmem:[%s541_s15 + $0x10] sm:$0xff] %v3527_v7  ;;  %v3522_v13 = vadd.f32 %v3942_v43, %v3795_v21 }
0x10a0   : > { %v3528_v45 = vadd.f32 %v3522_v13, %v5520_v20 }
0x10a2   : > { %3532 = vst [vmem:[%s541_s15 + $0x18] sm:$0xff] %v3528_v45 }
0x10a3   : > { %4720 = shalt.err (!%p4717_p6)
}
0x10a4   : > { %s4721_s24 = scalar_lea.hbm %s5712_s23, 512  ;;  %s4725_s9 = scalar_lea.hbm %s5769_s13, 1024 }
0x10a5   : > { %p4722_p4 = scmp.ne.s32.totalorder %s5712_s23, %s4721_s24  ;;  %p4726_p9 = scmp.lt.s32.totalorder %s5712_s23, %s5769_s13 }
0x10a6   : > { %p4727_p11 = scmp.lt.s32.totalorder %s4725_s9, %s4721_s24 }
0x10a7   : > { %p4723_p1 = pnand %p4722_p4, %p5808_p13 }
0x10a8   : > { %p4728_p10 = por %p4727_p11, %p4726_p9 }
0x10a9   : > { %p4724_p3 = pneg %p4723_p1 }
0x10ab   : > { %p4729_p12 = pnand %p4728_p10, %p4724_p3 }
0x10ad   : > { %4732 = shalt.err (!%p4729_p12)
}
0x10ae   : > { %s4806_s22 = smov 128   ;;  %s4807_s21 = smov 8  }
0x10af   : > { %4201 = dma.vmem_to_hbm [thread:$0]  (%p5808_p13), %s5707_s16, 512, %s5712_s23, %s3534_s3, %s4806_s22, %s4806_s22, %s4807_s21  }
0x10b0 PF: > { %s3562_s19 = sand.u32 1, %s4771_s25   ;;  %p5809_p0 = scmp.ne.s32.totalorder %s5796_s17, 0 }
0x10b1   : > { %p5810_p2 = scmp.ge.s32.totalorder %s4783_s28, 2  ;;  %s3563_s14 = scalar_lea.sflag [#allocation4], %s3562_s19 }
0x10b3   : > { %p4227_p5 = pnand %p5810_p2, %p5809_p0 }
0x10b5   : > { %p4228_p8 = pneg %p4227_p5 }
0x10b7   : > { %4766 = dma.done.wait (%p4228_p8), %s3563_s14, 512  }
0x10b8   : > { %4768 = vsyncadd (%p4228_p8), %s3563_s14, 4294966784  ;;  %s5811_s11 = sld [smem:[#allocation20_spill]]  ;;  %p29_p7 = scmp.ge.s32.totalorder %s4984_s18, 4  }
0x10b9   : > { %s5812_s25 = smov %s4775_s26  ;;  %s5813_s26 = smov %s4779_s27 }
0x10ba   : > { %s5815_s28 = smov %s4984_s18  ;;  %31 = sbr.rel (!%p29_p7) target bundleno = 15 (0xf), region = 141 }
0x10be   : > { %s5814_s27 = smov %s5811_s11 }
0x10bf   :  { %3568 = vsyncpa [#allocation3], 1 }
0x10c0   :  { %3570 = vsyncpa [#allocation3 + $0x1], 1 }
0x10c1   :  { %3571 = vsyncpa [#allocation6], 1 }
0x10c2   :  { %3572 = vsyncpa [#allocation9], 1 }
0x10c3   :  { %3573 = vsyncpa [#allocation12], 1 }
0x10c4   :  { %3574 = vsyncpa [#allocation4], 1 }
0x10c5   :  { %3576 = vsyncpa [#allocation4 + $0x1], 1 }

</bundles_post_ra>
